<compile_context>
chip_gen: v7x
topology: tpu7x:2x2x1
jax: 0.10.0
libtpu: 0.0.40
codegen_flags: <defaults>
</compile_context>

<pallas_src>
import functools
import numpy as np
import jax
import jax.numpy as jnp
from jax.experimental import pallas as pl
from jax.experimental.pallas import tpu as pltpu

LEAK = 0.2
# tap order = conv kernel K order: t = (oy+1)*3 + (ox+1)
OFFS = [(oy, ox) for oy in (-1, 0, 1) for ox in (-1, 0, 1)]


def _leaky(v):
    return jnp.where(v >= 0, v, LEAK * v)


def _ru8(n):
    return (n + 7) // 8 * 8


def interp_matrix(out_size, in_size):
    """1-D linear interpolation matrix matching torch Upsample(align_corners=True)."""
    idx = np.arange(out_size)
    if out_size == 1:
        src = np.zeros((out_size,), np.float64)
    else:
        src = idx * (in_size - 1) / (out_size - 1)
    i0 = np.clip(np.floor(src).astype(np.int64), 0, max(in_size - 2, 0))
    frac = (src - i0).astype(np.float32)
    M = np.zeros((out_size, in_size), np.float32)
    M[idx, i0] += 1.0 - frac
    M[idx, np.minimum(i0 + 1, in_size - 1)] += frac
    return M


def _height_lerp_table(H, h):
    """Per output row Y: (y0, y1, a0, a1) with out[Y] = a0*in[y0] + a1*in[y1]."""
    tbl = []
    for Y in range(H):
        if h == 1 or H == 1:
            tbl.append((0, 0, 1.0, 0.0))
            continue
        src = Y * (h - 1) / (H - 1)
        y0 = min(int(np.floor(src)), h - 2)
        fr = float(src - y0)
        tbl.append((y0, y0 + 1, 1.0 - fr, fr))
    return tbl


def _tap_masks(H, W):
    """(9, H*W) validity masks: tap (oy,ox) is valid iff (Y+oy, X+ox) in-bounds.
    One multiply per tap covers x-edges, y-edges AND whatever pltpu.roll wrapped."""
    ys, xs = np.arange(H * W) // W, np.arange(H * W) % W
    m = np.zeros((9, H * W), np.float32)
    for t, (oy, ox) in enumerate(OFFS):
        m[t] = ((ys + oy >= 0) & (ys + oy <= H - 1) &
                (xs + ox >= 0) & (xs + ox <= W - 1)).astype(np.float32)
    return m


def decoder_forward(skip, x, w1, b1, w2, b2, wres, compute_dtype=jnp.bfloat16):
    """Fused Decoder forward.

    skip: (B, Cs, H, W)  x: (B, Cx, H/2, W/2)  ->  (B, Cs, H, W)   (all NCHW)
    w1: (3,3,Cin,Cout) HWIO, b1: (Cout,), w2: (3,3,Cout,Cout) HWIO, b2: (Cout,),
    wres: (Cin, Cout);  Cin = Cs + Cx, Cout = Cs.
    compute_dtype: dtype of the MXU operands (im2col scratch + conv weights);
    accumulation is always f32.
    """
    B, Cs, H, W = skip.shape
    Bx, Cx, h, w = x.shape
    assert Bx == B and H == 2 * h and W == 2 * w and W > 1
    Cin, Cout, HW = Cs + Cx, Cs, H * W
    Cs_p, Cx_p, Cout_p = _ru8(Cs), _ru8(Cx), _ru8(Cout)
    Cin_p = Cs_p + Cx_p
    cdt = compute_dtype

    # ------------------ host-side layout prep (tiny / layout-only) ----------
    skip_flat = skip.reshape(B, Cs, HW)                 # NCHW -> (B, C, H*W): free
    # x rows reordered to (y, c) so the in-kernel height lerp reads contiguous
    # channel blocks; x is the small pre-upsample tensor so this is cheap.
    x_perm = jnp.transpose(x, (0, 2, 1, 3)).reshape(B, h * Cx, w)
    mxT = jnp.asarray(interp_matrix(W, w).T)            # (w, W) f32 coefficients
    ytab = _height_lerp_table(H, h)                     # python compile-time consts
    tapmask = jnp.asarray(_tap_masks(H, W))             # (9, HW) f32

    # Conv weights flattened to (*, 9*Cin_p); K ordered (tap, channel) with a
    # per-tap channel layout [skip | pad->Cs_p | x | pad->Cx_p] so every tap row
    # range starts on a sublane-tile boundary.  The 1x1 residual (bias=False in
    # the module) is appended as Cout_p extra output rows acting only on the
    # centre tap -> conv1 + residual = ONE matmul.
    w1t = jnp.transpose(w1, (3, 0, 1, 2)).reshape(Cout, 9, Cin)
    w1t = jnp.concatenate(
        [jnp.pad(w1t[:, :, :Cs], ((0, 0), (0, 0), (0, Cs_p - Cs))),
         jnp.pad(w1t[:, :, Cs:], ((0, 0), (0, 0), (0, Cx_p - Cx)))],
        axis=2).reshape(Cout, 9 * Cin_p)
    w1blk = jnp.pad(w1t, ((0, Cout_p - Cout), (0, 0)))          # (Cout_p, 9*Cin_p)
    wres_blk = (jnp.zeros((Cout_p, 9 * Cin_p), w1.dtype)
                .at[:Cout, 4 * Cin_p:4 * Cin_p + Cs].set(wres[:Cs].T)
                .at[:Cout, 4 * Cin_p + Cs_p:4 * Cin_p + Cs_p + Cx].set(wres[Cs:].T))
    w1aug = jnp.concatenate([w1blk, wres_blk], axis=0).astype(cdt)   # (2*Cout_p, 9*Cin_p)

    w2t = jnp.transpose(w2, (3, 0, 1, 2)).reshape(Cout, 9, Cout)
    w2t = jnp.pad(w2t, ((0, 0), (0, 0), (0, Cout_p - Cout))).reshape(Cout, 9 * Cout_p)
    w2f = jnp.pad(w2t, ((0, Cout_p - Cout), (0, 0))).astype(cdt)     # (Cout_p, 9*Cout_p)
    b1c = b1.reshape(Cout, 1).astype(jnp.float32)
    b2c = b2.reshape(Cout, 1).astype(jnp.float32)

    xc0 = 4 * Cin_p + Cs_p      # centre-tap x-channel rows inside the col scratch

    # ------------------------------ kernel ----------------------------------
    def kernel(skip_ref, x_ref, mxT_ref, mask_ref, w1a_ref, b1_ref, w2_ref, b2_ref,
               o_ref, col_ref, xw_ref):
        f32 = jnp.float32

        # Keep the zero-weight channel-pad rows finite (garbage * 0 could be NaN).
        for t in range(9):
            if Cs_p != Cs:
                col_ref[t * Cin_p + Cs:t * Cin_p + Cs_p, :] = (
                    jnp.zeros((Cs_p - Cs, HW), col_ref.dtype))
            if Cx_p != Cx:
                col_ref[t * Cin_p + Cs_p + Cx:(t + 1) * Cin_p, :] = (
                    jnp.zeros((Cx_p - Cx, HW), col_ref.dtype))

        # ---- separable bilinear x2 upsample (align_corners=True) ----
        # width interp: (h*Cx, w) @ (w, W); rows ordered (y, c).
        xw_ref[...] = jnp.dot(x_ref[0], mxT_ref[...], preferred_element_type=f32)
        # height interp: 2-tap lincomb per output row, written straight into the
        # centre-tap x-channel block of the im2col scratch (this IS x_up).
        for Y in range(H):
            y0, y1, a0, a1 = ytab[Y]
            r0 = xw_ref[y0 * Cx:(y0 + 1) * Cx, :]
            if a1 == 0.0:
                row = r0
            else:
                row = a0 * r0 + a1 * xw_ref[y1 * Cx:(y1 + 1) * Cx, :]
            col_ref[xc0:xc0 + Cx, Y * W:(Y + 1) * W] = row.astype(col_ref.dtype)

        def write_taps(src, C, base, stride, skip_center=False):
            # src: (C, HW) f32 value.  tap (oy,ox) -> col rows [t*stride+base, +C),
            # realised as roll (XLU) + combined-mask mul (VPU) + ONE full-width
            # lane-aligned store (the mask zeroes x/y edges and the roll wrap).
            for t, (oy, ox) in enumerate(OFFS):
                r = t * stride + base
                d = oy * W + ox
                if d == 0:
                    if not skip_center:
                        col_ref[r:r + C, :] = src.astype(col_ref.dtype)
                else:
                    tap = (pltpu.roll(src, shift=(-d) % HW, axis=1)
                           * mask_ref[t:t + 1, :])
                    col_ref[r:r + C, :] = tap.astype(col_ref.dtype)

        # ---- conv1 (3x3) + 1x1 residual: one K = 9*Cin_p matmul ----
        skip2d = skip_ref[0].astype(f32)                         # (Cs, HW)
        write_taps(skip2d, Cs, 0, Cin_p)
        xup = col_ref[xc0:xc0 + Cx, :].astype(f32)               # centre tap done
        write_taps(xup, Cx, Cs_p, Cin_p, skip_center=True)

        both = jnp.dot(w1a_ref[...], col_ref[...],
                       preferred_element_type=f32)               # (2*Cout_p, HW)
        h1 = _leaky(both[0:Cout] + b1_ref[...])                  # (Cout, HW) f32
        # Stage the residual rows in o_ref so no extra (Cout, HW) f32 value stays
        # live across the conv2 im2col + matmul (perf-review item).
        o_ref[0] = both[Cout_p:Cout_p + Cout].astype(o_ref.dtype)

        # ---- conv2 (3x3): one K = 9*Cout_p matmul, reusing the col scratch ----
        write_taps(h1, Cout, 0, Cout_p)
        acc2 = jnp.dot(w2_ref[...], col_ref[0:9 * Cout_p, :],
                       preferred_element_type=f32)               # (Cout_p, HW)
        out = _leaky(acc2[0:Cout] + b2_ref[...] + o_ref[0].astype(f32))
        o_ref[0] = out.astype(o_ref.dtype)

    # explicit VMEM budget: col + xw scratch, double-buffered IO, constants (x2)
    cbytes = jnp.dtype(cdt).itemsize
    budget = (9 * Cin_p * HW * cbytes + h * Cx * W * 4
              + 2 * (Cs * HW + h * Cx * w + Cout * HW) * 4
              + 2 * (w * W * 4 + 9 * HW * 4 + 2 * Cout * 4
                     + (2 * Cout_p * 9 * Cin_p + Cout_p * 9 * Cout_p) * cbytes))
    vmem_limit = int(min(96 * 2 ** 20, max(32 * 2 ** 20, 2 * budget)))

    out_flat = pl.pallas_call(
        kernel,
        out_shape=jax.ShapeDtypeStruct((B, Cout, HW), skip.dtype),
        grid_spec=pltpu.PrefetchScalarGridSpec(
            num_scalar_prefetch=0,
            grid=(B,),
            in_specs=[
                pl.BlockSpec((1, Cs, HW), lambda b: (b, 0, 0)),
                pl.BlockSpec((1, h * Cx, w), lambda b: (b, 0, 0)),
                pl.BlockSpec((w, W), lambda b: (0, 0)),
                pl.BlockSpec((9, HW), lambda b: (0, 0)),
                pl.BlockSpec((2 * Cout_p, 9 * Cin_p), lambda b: (0, 0)),
                pl.BlockSpec((Cout, 1), lambda b: (0, 0)),
                pl.BlockSpec((Cout_p, 9 * Cout_p), lambda b: (0, 0)),
                pl.BlockSpec((Cout, 1), lambda b: (0, 0)),
            ],
            out_specs=pl.BlockSpec((1, Cout, HW), lambda b: (b, 0, 0)),
            scratch_shapes=[pltpu.VMEM((9 * Cin_p, HW), cdt),
                            pltpu.VMEM((h * Cx, W), jnp.float32)],
        ),
        compiler_params=pltpu.CompilerParams(
            dimension_semantics=("parallel",),
            vmem_limit_bytes=vmem_limit),
    )(skip_flat, x_perm, mxT, tapmask, w1aug, b1c, w2f, b2c)

    # (B, Cout, H*W) -> (B, Cout, H, W): already NCHW, free reshape, no transpose.
    return out_flat.reshape(B, Cout, H, W)


# --------------------------- plain-XLA reference ----------------------------
def decoder_reference(skip, x, w1, b1, w2, b2, wres):
    P = jax.lax.Precision.HIGHEST
    skip_t = jnp.transpose(skip, (0, 2, 3, 1))
    x_t = jnp.transpose(x, (0, 2, 3, 1))
    _, h, w, _ = x_t.shape
    H, W = 2 * h, 2 * w
    Ly = jnp.asarray(interp_matrix(H, h))
    Lx = jnp.asarray(interp_matrix(W, w))
    x_up = jnp.einsum('Hh,bhwc,Ww->bHWc', Ly, x_t, Lx, precision=P)
    cat = jnp.concatenate([skip_t, x_up], axis=-1)

    def conv3(z, wgt, bias):
        out = jax.lax.conv_general_dilated(
            z, wgt, (1, 1), 'SAME',
            dimension_numbers=('NHWC', 'HWIO', 'NHWC'), precision=P)
        return out + bias.reshape(1, 1, 1, -1)

    h1 = _leaky(conv3(cat, w1, b1))
    h2 = conv3(h1, w2, b2)
    res = jnp.einsum('bhwc,cd->bhwd', cat, wres, precision=P)
    out = _leaky(h2 + res)
    return jnp.transpose(out, (0, 3, 1, 2))


if __name__ == "__main__":
    B, C, H, W = 2, 4, 16, 16          # skip: (B, C, H, W); x: (B, 2C, H/2, W/2)
    Cs, Cx = C, 2 * C
    Cin, Cout = Cs + Cx, Cs

    key = jax.random.PRNGKey(0)
    k1, k2, k3, k4, k5, k6, k7 = jax.random.split(key, 7)
    skip = jax.random.normal(k1, (B, Cs, H, W), jnp.float32)
    x = jax.random.normal(k2, (B, Cx, H // 2, W // 2), jnp.float32)
    w1 = 0.1 * jax.random.normal(k3, (3, 3, Cin, Cout), jnp.float32)   # HWIO
    b1 = 0.1 * jax.random.normal(k4, (Cout,), jnp.float32)
    w2 = 0.1 * jax.random.normal(k5, (3, 3, Cout, Cout), jnp.float32)  # HWIO
    b2 = 0.1 * jax.random.normal(k6, (Cout,), jnp.float32)
    wres = 0.1 * jax.random.normal(k7, (Cin, Cout), jnp.float32)

    ref = decoder_reference(skip, x, w1, b1, w2, b2, wres)

    # f32-operand run: tight structural check against the XLA reference.
    fwd_f32 = jax.jit(functools.partial(decoder_forward, compute_dtype=jnp.float32))
    out_f32 = jax.block_until_ready(fwd_f32(skip, x, w1, b1, w2, b2, wres))
    assert out_f32.shape == (B, Cout, H, W), out_f32.shape
    err_f32 = float(jnp.max(jnp.abs(out_f32 - ref)))
    assert err_f32 < 1e-3, f"f32 max abs err {err_f32}"

    # default bf16-operand / f32-accumulation run: production configuration.
    fwd_bf16 = jax.jit(functools.partial(decoder_forward, compute_dtype=jnp.bfloat16))
    out_bf16 = jax.block_until_ready(fwd_bf16(skip, x, w1, b1, w2, b2, wres))
    err_bf16 = float(jnp.max(jnp.abs(out_bf16 - ref)))
    assert err_bf16 < 5e-2, f"bf16 max abs err {err_bf16}"

    print("KERNEL_OK")
</pallas_src>

<mosaic_0001>
module attributes {stable_mosaic.version = 11 : i64} {
  func.func @kernel(%arg0: i32, %arg1: memref<1x4x256xf32, #tpu.memory_space<vmem>>, %arg2: memref<1x64x8xf32, #tpu.memory_space<vmem>>, %arg3: memref<8x16xf32, #tpu.memory_space<vmem>>, %arg4: memref<9x256xf32, #tpu.memory_space<vmem>>, %arg5: memref<16x144xf32, #tpu.memory_space<vmem>>, %arg6: memref<4x1xf32, #tpu.memory_space<vmem>>, %arg7: memref<8x72xf32, #tpu.memory_space<vmem>>, %arg8: memref<4x1xf32, #tpu.memory_space<vmem>>, %arg9: memref<1x4x256xf32, #tpu.memory_space<vmem>>, %arg10: memref<144x256xf32, #tpu.memory_space<vmem>>, %arg11: memref<64x16xf32, #tpu.memory_space<vmem>>) attributes {dimension_semantics = [#tpu.dimension_semantics<parallel>], iteration_bounds = array<i64: 2>, scalar_prefetch = 0 : i64, scratch_operands = 2 : i64, tpu.core_type = #tpu.core_type<tc>, window_params = [{transform_indices = @transform_0, window_bounds = array<i64: 1, 4, 256>}, {transform_indices = @transform_1, window_bounds = array<i64: 1, 64, 8>}, {pipeline_mode = #tpu.pipeline_mode<synchronous>, transform_indices = @transform_2, window_bounds = array<i64: 8, 16>}, {pipeline_mode = #tpu.pipeline_mode<synchronous>, transform_indices = @transform_3, window_bounds = array<i64: 9, 256>}, {pipeline_mode = #tpu.pipeline_mode<synchronous>, transform_indices = @transform_4, window_bounds = array<i64: 16, 144>}, {pipeline_mode = #tpu.pipeline_mode<synchronous>, transform_indices = @transform_5, window_bounds = array<i64: 4, 1>}, {pipeline_mode = #tpu.pipeline_mode<synchronous>, transform_indices = @transform_6, window_bounds = array<i64: 8, 72>}, {pipeline_mode = #tpu.pipeline_mode<synchronous>, transform_indices = @transform_7, window_bounds = array<i64: 4, 1>}, {transform_indices = @transform_8, window_bounds = array<i64: 1, 4, 256>}]} {
    %cst = arith.constant 0.000000e+00 : f32
    %0 = vector.broadcast %cst : f32 to vector<4x256xf32>
    %c4 = arith.constant 4 : index
    %c0 = arith.constant 0 : index
    %1 = vector.load %arg10[%c4, %c0] : memref<144x256xf32, #tpu.memory_space<vmem>>, vector<4x256xf32>
    tpu.vector_store %arg10[%c4, %c0], %0 {strides = array<i32>} : memref<144x256xf32, #tpu.memory_space<vmem>>, vector<4x256xf32>,
    %cst_0 = arith.constant 0.000000e+00 : f32
    %2 = vector.broadcast %cst_0 : f32 to vector<4x256xf32>
    %c20 = arith.constant 20 : index
    %c0_1 = arith.constant 0 : index
    %3 = vector.load %arg10[%c20, %c0_1] : memref<144x256xf32, #tpu.memory_space<vmem>>, vector<4x256xf32>
    tpu.vector_store %arg10[%c20, %c0_1], %2 {strides = array<i32>} : memref<144x256xf32, #tpu.memory_space<vmem>>, vector<4x256xf32>,
    %cst_2 = arith.constant 0.000000e+00 : f32
    %4 = vector.broadcast %cst_2 : f32 to vector<4x256xf32>
    %c36 = arith.constant 36 : index
    %c0_3 = arith.constant 0 : index
    %5 = vector.load %arg10[%c36, %c0_3] : memref<144x256xf32, #tpu.memory_space<vmem>>, vector<4x256xf32>
    tpu.vector_store %arg10[%c36, %c0_3], %4 {strides = array<i32>} : memref<144x256xf32, #tpu.memory_space<vmem>>, vector<4x256xf32>,
    %cst_4 = arith.constant 0.000000e+00 : f32
    %6 = vector.broadcast %cst_4 : f32 to vector<4x256xf32>
    %c52 = arith.constant 52 : index
    %c0_5 = arith.constant 0 : index
    %7 = vector.load %arg10[%c52, %c0_5] : memref<144x256xf32, #tpu.memory_space<vmem>>, vector<4x256xf32>
    tpu.vector_store %arg10[%c52, %c0_5], %6 {strides = array<i32>} : memref<144x256xf32, #tpu.memory_space<vmem>>, vector<4x256xf32>,
    %cst_6 = arith.constant 0.000000e+00 : f32
    %8 = vector.broadcast %cst_6 : f32 to vector<4x256xf32>
    %c68 = arith.constant 68 : index
    %c0_7 = arith.constant 0 : index
    %9 = vector.load %arg10[%c68, %c0_7] : memref<144x256xf32, #tpu.memory_space<vmem>>, vector<4x256xf32>
    tpu.vector_store %arg10[%c68, %c0_7], %8 {strides = array<i32>} : memref<144x256xf32, #tpu.memory_space<vmem>>, vector<4x256xf32>,
    %cst_8 = arith.constant 0.000000e+00 : f32
    %10 = vector.broadcast %cst_8 : f32 to vector<4x256xf32>
    %c84 = arith.constant 84 : index
    %c0_9 = arith.constant 0 : index
    %11 = vector.load %arg10[%c84, %c0_9] : memref<144x256xf32, #tpu.memory_space<vmem>>, vector<4x256xf32>
    tpu.vector_store %arg10[%c84, %c0_9], %10 {strides = array<i32>} : memref<144x256xf32, #tpu.memory_space<vmem>>, vector<4x256xf32>,
    %cst_10 = arith.constant 0.000000e+00 : f32
    %12 = vector.broadcast %cst_10 : f32 to vector<4x256xf32>
    %c100 = arith.constant 100 : index
    %c0_11 = arith.constant 0 : index
    %13 = vector.load %arg10[%c100, %c0_11] : memref<144x256xf32, #tpu.memory_space<vmem>>, vector<4x256xf32>
    tpu.vector_store %arg10[%c100, %c0_11], %12 {strides = array<i32>} : memref<144x256xf32, #tpu.memory_space<vmem>>, vector<4x256xf32>,
    %cst_12 = arith.constant 0.000000e+00 : f32
    %14 = vector.broadcast %cst_12 : f32 to vector<4x256xf32>
    %c116 = arith.constant 116 : index
    %c0_13 = arith.constant 0 : index
    %15 = vector.load %arg10[%c116, %c0_13] : memref<144x256xf32, #tpu.memory_space<vmem>>, vector<4x256xf32>
    tpu.vector_store %arg10[%c116, %c0_13], %14 {strides = array<i32>} : memref<144x256xf32, #tpu.memory_space<vmem>>, vector<4x256xf32>,
    %cst_14 = arith.constant 0.000000e+00 : f32
    %16 = vector.broadcast %cst_14 : f32 to vector<4x256xf32>
    %c132 = arith.constant 132 : index
    %c0_15 = arith.constant 0 : index
    %17 = vector.load %arg10[%c132, %c0_15] : memref<144x256xf32, #tpu.memory_space<vmem>>, vector<4x256xf32>
    tpu.vector_store %arg10[%c132, %c0_15], %16 {strides = array<i32>} : memref<144x256xf32, #tpu.memory_space<vmem>>, vector<4x256xf32>,
    %c0_16 = arith.constant 0 : index
    %c0_17 = arith.constant 0 : index
    %c0_18 = arith.constant 0 : index
    %18 = vector.load %arg2[%c0_16, %c0_17, %c0_18] : memref<1x64x8xf32, #tpu.memory_space<vmem>>, vector<1x64x8xf32>
    %19 = vector.shape_cast %18 : vector<1x64x8xf32> to vector<64x8xf32>
    %c0_19 = arith.constant 0 : index
    %c0_20 = arith.constant 0 : index
    %20 = vector.load %arg3[%c0_19, %c0_20] : memref<8x16xf32, #tpu.memory_space<vmem>>, vector<8x16xf32>
    %cst_21 = arith.constant dense<0.000000e+00> : vector<64x16xf32>
    %21 = tpu.matmul %19, %20, %cst_21 {dimension_numbers = #tpu.dot_dimension_numbers<[1], [0], [0], [1], [0, 0, 1, 1], [], []>} : vector<64x8xf32>, vector<8x16xf32>, vector<64x16xf32> -> vector<64x16xf32>
    %c0_22 = arith.constant 0 : index
    %c0_23 = arith.constant 0 : index
    %22 = vector.load %arg11[%c0_22, %c0_23] : memref<64x16xf32, #tpu.memory_space<vmem>>, vector<64x16xf32>
    tpu.vector_store %arg11[%c0_22, %c0_23], %21 {strides = array<i32>} : memref<64x16xf32, #tpu.memory_space<vmem>>, vector<64x16xf32>,
    %c0_24 = arith.constant 0 : index
    %c0_25 = arith.constant 0 : index
    %23 = vector.load %arg11[%c0_24, %c0_25] : memref<64x16xf32, #tpu.memory_space<vmem>>, vector<8x16xf32>
    %c72 = arith.constant 72 : index
    %c0_26 = arith.constant 0 : index
    %24 = vector.load %arg10[%c72, %c0_26] : memref<144x256xf32, #tpu.memory_space<vmem>>, vector<8x16xf32>
    tpu.vector_store %arg10[%c72, %c0_26], %23 {strides = array<i32>} : memref<144x256xf32, #tpu.memory_space<vmem>>, vector<8x16xf32>,
    %c0_27 = arith.constant 0 : index
    %c0_28 = arith.constant 0 : index
    %25 = vector.load %arg11[%c0_27, %c0_28] : memref<64x16xf32, #tpu.memory_space<vmem>>, vector<8x16xf32>
    %cst_29 = arith.constant 0.533333361 : f32
    %26 = vector.broadcast %cst_29 : f32 to vector<8x16xf32>
    %27 = arith.mulf %26, %25 : vector<8x16xf32>
    %c8 = arith.constant 8 : index
    %c0_30 = arith.constant 0 : index
    %28 = vector.load %arg11[%c8, %c0_30] : memref<64x16xf32, #tpu.memory_space<vmem>>, vector<8x16xf32>
    %cst_31 = arith.constant 0.466666669 : f32
    %29 = vector.broadcast %cst_31 : f32 to vector<8x16xf32>
    %30 = arith.mulf %29, %28 : vector<8x16xf32>
    %31 = arith.addf %27, %30 : vector<8x16xf32>
    %c72_32 = arith.constant 72 : index
    %c16 = arith.constant 16 : index
    %32 = vector.load %arg10[%c72_32, %c16] : memref<144x256xf32, #tpu.memory_space<vmem>>, vector<8x16xf32>
    tpu.vector_store %arg10[%c72_32, %c16], %31 {strides = array<i32>} : memref<144x256xf32, #tpu.memory_space<vmem>>, vector<8x16xf32>,
    %c0_33 = arith.constant 0 : index
    %c0_34 = arith.constant 0 : index
    %33 = vector.load %arg11[%c0_33, %c0_34] : memref<64x16xf32, #tpu.memory_space<vmem>>, vector<8x16xf32>
    %cst_35 = arith.constant 0.0666666701 : f32
    %34 = vector.broadcast %cst_35 : f32 to vector<8x16xf32>
    %35 = arith.mulf %34, %33 : vector<8x16xf32>
    %c8_36 = arith.constant 8 : index
    %c0_37 = arith.constant 0 : index
    %36 = vector.load %arg11[%c8_36, %c0_37] : memref<64x16xf32, #tpu.memory_space<vmem>>, vector<8x16xf32>
    %cst_38 = arith.constant 0.933333337 : f32
    %37 = vector.broadcast %cst_38 : f32 to vector<8x16xf32>
    %38 = arith.mulf %37, %36 : vector<8x16xf32>
    %39 = arith.addf %35, %38 : vector<8x16xf32>
    %c72_39 = arith.constant 72 : index
    %c32 = arith.constant 32 : index
    %40 = vector.load %arg10[%c72_39, %c32] : memref<144x256xf32, #tpu.memory_space<vmem>>, vector<8x16xf32>
    tpu.vector_store %arg10[%c72_39, %c32], %39 {strides = array<i32>} : memref<144x256xf32, #tpu.memory_space<vmem>>, vector<8x16xf32>,
    %c8_40 = arith.constant 8 : index
    %c0_41 = arith.constant 0 : index
    %41 = vector.load %arg11[%c8_40, %c0_41] : memref<64x16xf32, #tpu.memory_space<vmem>>, vector<8x16xf32>
    %cst_42 = arith.constant 6.000000e-01 : f32
    %42 = vector.broadcast %cst_42 : f32 to vector<8x16xf32>
    %43 = arith.mulf %42, %41 : vector<8x16xf32>
    %c16_43 = arith.constant 16 : index
    %c0_44 = arith.constant 0 : index
    %44 = vector.load %arg11[%c16_43, %c0_44] : memref<64x16xf32, #tpu.memory_space<vmem>>, vector<8x16xf32>
    %cst_45 = arith.constant 4.000000e-01 : f32
    %45 = vector.broadcast %cst_45 : f32 to vector<8x16xf32>
    %46 = arith.mulf %45, %44 : vector<8x16xf32>
    %47 = arith.addf %43, %46 : vector<8x16xf32>
    %c72_46 = arith.constant 72 : index
    %c48 = arith.constant 48 : index
    %48 = vector.load %arg10[%c72_46, %c48] : memref<144x256xf32, #tpu.memory_space<vmem>>, vector<8x16xf32>
    tpu.vector_store %arg10[%c72_46, %c48], %47 {strides = array<i32>} : memref<144x256xf32, #tpu.memory_space<vmem>>, vector<8x16xf32>,
    %c8_47 = arith.constant 8 : index
    %c0_48 = arith.constant 0 : index
    %49 = vector.load %arg11[%c8_47, %c0_48] : memref<64x16xf32, #tpu.memory_space<vmem>>, vector<8x16xf32>
    %cst_49 = arith.constant 0.13333334 : f32
    %50 = vector.broadcast %cst_49 : f32 to vector<8x16xf32>
    %51 = arith.mulf %50, %49 : vector<8x16xf32>
    %c16_50 = arith.constant 16 : index
    %c0_51 = arith.constant 0 : index
    %52 = vector.load %arg11[%c16_50, %c0_51] : memref<64x16xf32, #tpu.memory_space<vmem>>, vector<8x16xf32>
    %cst_52 = arith.constant 0.866666674 : f32
    %53 = vector.broadcast %cst_52 : f32 to vector<8x16xf32>
    %54 = arith.mulf %53, %52 : vector<8x16xf32>
    %55 = arith.addf %51, %54 : vector<8x16xf32>
    %c72_53 = arith.constant 72 : index
    %c64 = arith.constant 64 : index
    %56 = vector.load %arg10[%c72_53, %c64] : memref<144x256xf32, #tpu.memory_space<vmem>>, vector<8x16xf32>
    tpu.vector_store %arg10[%c72_53, %c64], %55 {strides = array<i32>} : memref<144x256xf32, #tpu.memory_space<vmem>>, vector<8x16xf32>,
    %c16_54 = arith.constant 16 : index
    %c0_55 = arith.constant 0 : index
    %57 = vector.load %arg11[%c16_54, %c0_55] : memref<64x16xf32, #tpu.memory_space<vmem>>, vector<8x16xf32>
    %cst_56 = arith.constant 0.666666686 : f32
    %58 = vector.broadcast %cst_56 : f32 to vector<8x16xf32>
    %59 = arith.mulf %58, %57 : vector<8x16xf32>
    %c24 = arith.constant 24 : index
    %c0_57 = arith.constant 0 : index
    %60 = vector.load %arg11[%c24, %c0_57] : memref<64x16xf32, #tpu.memory_space<vmem>>, vector<8x16xf32>
    %cst_58 = arith.constant 0.333333343 : f32
    %61 = vector.broadcast %cst_58 : f32 to vector<8x16xf32>
    %62 = arith.mulf %61, %60 : vector<8x16xf32>
    %63 = arith.addf %59, %62 : vector<8x16xf32>
    %c72_59 = arith.constant 72 : index
    %c80 = arith.constant 80 : index
    %64 = vector.load %arg10[%c72_59, %c80] : memref<144x256xf32, #tpu.memory_space<vmem>>, vector<8x16xf32>
    tpu.vector_store %arg10[%c72_59, %c80], %63 {strides = array<i32>} : memref<144x256xf32, #tpu.memory_space<vmem>>, vector<8x16xf32>,
    %c16_60 = arith.constant 16 : index
    %c0_61 = arith.constant 0 : index
    %65 = vector.load %arg11[%c16_60, %c0_61] : memref<64x16xf32, #tpu.memory_space<vmem>>, vector<8x16xf32>
    %cst_62 = arith.constant 2.000000e-01 : f32
    %66 = vector.broadcast %cst_62 : f32 to vector<8x16xf32>
    %67 = arith.mulf %66, %65 : vector<8x16xf32>
    %c24_63 = arith.constant 24 : index
    %c0_64 = arith.constant 0 : index
    %68 = vector.load %arg11[%c24_63, %c0_64] : memref<64x16xf32, #tpu.memory_space<vmem>>, vector<8x16xf32>
    %cst_65 = arith.constant 8.000000e-01 : f32
    %69 = vector.broadcast %cst_65 : f32 to vector<8x16xf32>
    %70 = arith.mulf %69, %68 : vector<8x16xf32>
    %71 = arith.addf %67, %70 : vector<8x16xf32>
    %c72_66 = arith.constant 72 : index
    %c96 = arith.constant 96 : index
    %72 = vector.load %arg10[%c72_66, %c96] : memref<144x256xf32, #tpu.memory_space<vmem>>, vector<8x16xf32>
    tpu.vector_store %arg10[%c72_66, %c96], %71 {strides = array<i32>} : memref<144x256xf32, #tpu.memory_space<vmem>>, vector<8x16xf32>,
    %c24_67 = arith.constant 24 : index
    %c0_68 = arith.constant 0 : index
    %73 = vector.load %arg11[%c24_67, %c0_68] : memref<64x16xf32, #tpu.memory_space<vmem>>, vector<8x16xf32>
    %cst_69 = arith.constant 0.733333349 : f32
    %74 = vector.broadcast %cst_69 : f32 to vector<8x16xf32>
    %75 = arith.mulf %74, %73 : vector<8x16xf32>
    %c32_70 = arith.constant 32 : index
    %c0_71 = arith.constant 0 : index
    %76 = vector.load %arg11[%c32_70, %c0_71] : memref<64x16xf32, #tpu.memory_space<vmem>>, vector<8x16xf32>
    %cst_72 = arith.constant 0.266666681 : f32
    %77 = vector.broadcast %cst_72 : f32 to vector<8x16xf32>
    %78 = arith.mulf %77, %76 : vector<8x16xf32>
    %79 = arith.addf %75, %78 : vector<8x16xf32>
    %c72_73 = arith.constant 72 : index
    %c112 = arith.constant 112 : index
    %80 = vector.load %arg10[%c72_73, %c112] : memref<144x256xf32, #tpu.memory_space<vmem>>, vector<8x16xf32>
    tpu.vector_store %arg10[%c72_73, %c112], %79 {strides = array<i32>} : memref<144x256xf32, #tpu.memory_space<vmem>>, vector<8x16xf32>,
    %c24_74 = arith.constant 24 : index
    %c0_75 = arith.constant 0 : index
    %81 = vector.load %arg11[%c24_74, %c0_75] : memref<64x16xf32, #tpu.memory_space<vmem>>, vector<8x16xf32>
    %cst_76 = arith.constant 0.266666681 : f32
    %82 = vector.broadcast %cst_76 : f32 to vector<8x16xf32>
    %83 = arith.mulf %82, %81 : vector<8x16xf32>
    %c32_77 = arith.constant 32 : index
    %c0_78 = arith.constant 0 : index
    %84 = vector.load %arg11[%c32_77, %c0_78] : memref<64x16xf32, #tpu.memory_space<vmem>>, vector<8x16xf32>
    %cst_79 = arith.constant 0.733333349 : f32
    %85 = vector.broadcast %cst_79 : f32 to vector<8x16xf32>
    %86 = arith.mulf %85, %84 : vector<8x16xf32>
    %87 = arith.addf %83, %86 : vector<8x16xf32>
    %c72_80 = arith.constant 72 : index
    %c128 = arith.constant 128 : index
    %88 = vector.load %arg10[%c72_80, %c128] : memref<144x256xf32, #tpu.memory_space<vmem>>, vector<8x16xf32>
    tpu.vector_store %arg10[%c72_80, %c128], %87 {strides = array<i32>} : memref<144x256xf32, #tpu.memory_space<vmem>>, vector<8x16xf32>,
    %c32_81 = arith.constant 32 : index
    %c0_82 = arith.constant 0 : index
    %89 = vector.load %arg11[%c32_81, %c0_82] : memref<64x16xf32, #tpu.memory_space<vmem>>, vector<8x16xf32>
    %cst_83 = arith.constant 8.000000e-01 : f32
    %90 = vector.broadcast %cst_83 : f32 to vector<8x16xf32>
    %91 = arith.mulf %90, %89 : vector<8x16xf32>
    %c40 = arith.constant 40 : index
    %c0_84 = arith.constant 0 : index
    %92 = vector.load %arg11[%c40, %c0_84] : memref<64x16xf32, #tpu.memory_space<vmem>>, vector<8x16xf32>
    %cst_85 = arith.constant 2.000000e-01 : f32
    %93 = vector.broadcast %cst_85 : f32 to vector<8x16xf32>
    %94 = arith.mulf %93, %92 : vector<8x16xf32>
    %95 = arith.addf %91, %94 : vector<8x16xf32>
    %c72_86 = arith.constant 72 : index
    %c144 = arith.constant 144 : index
    %96 = vector.load %arg10[%c72_86, %c144] : memref<144x256xf32, #tpu.memory_space<vmem>>, vector<8x16xf32>
    tpu.vector_store %arg10[%c72_86, %c144], %95 {strides = array<i32>} : memref<144x256xf32, #tpu.memory_space<vmem>>, vector<8x16xf32>,
    %c32_87 = arith.constant 32 : index
    %c0_88 = arith.constant 0 : index
    %97 = vector.load %arg11[%c32_87, %c0_88] : memref<64x16xf32, #tpu.memory_space<vmem>>, vector<8x16xf32>
    %cst_89 = arith.constant 0.333333343 : f32
    %98 = vector.broadcast %cst_89 : f32 to vector<8x16xf32>
    %99 = arith.mulf %98, %97 : vector<8x16xf32>
    %c40_90 = arith.constant 40 : index
    %c0_91 = arith.constant 0 : index
    %100 = vector.load %arg11[%c40_90, %c0_91] : memref<64x16xf32, #tpu.memory_space<vmem>>, vector<8x16xf32>
    %cst_92 = arith.constant 0.666666686 : f32
    %101 = vector.broadcast %cst_92 : f32 to vector<8x16xf32>
    %102 = arith.mulf %101, %100 : vector<8x16xf32>
    %103 = arith.addf %99, %102 : vector<8x16xf32>
    %c72_93 = arith.constant 72 : index
    %c160 = arith.constant 160 : index
    %104 = vector.load %arg10[%c72_93, %c160] : memref<144x256xf32, #tpu.memory_space<vmem>>, vector<8x16xf32>
    tpu.vector_store %arg10[%c72_93, %c160], %103 {strides = array<i32>} : memref<144x256xf32, #tpu.memory_space<vmem>>, vector<8x16xf32>,
    %c40_94 = arith.constant 40 : index
    %c0_95 = arith.constant 0 : index
    %105 = vector.load %arg11[%c40_94, %c0_95] : memref<64x16xf32, #tpu.memory_space<vmem>>, vector<8x16xf32>
    %cst_96 = arith.constant 0.866666674 : f32
    %106 = vector.broadcast %cst_96 : f32 to vector<8x16xf32>
    %107 = arith.mulf %106, %105 : vector<8x16xf32>
    %c48_97 = arith.constant 48 : index
    %c0_98 = arith.constant 0 : index
    %108 = vector.load %arg11[%c48_97, %c0_98] : memref<64x16xf32, #tpu.memory_space<vmem>>, vector<8x16xf32>
    %cst_99 = arith.constant 0.13333334 : f32
    %109 = vector.broadcast %cst_99 : f32 to vector<8x16xf32>
    %110 = arith.mulf %109, %108 : vector<8x16xf32>
    %111 = arith.addf %107, %110 : vector<8x16xf32>
    %c72_100 = arith.constant 72 : index
    %c176 = arith.constant 176 : index
    %112 = vector.load %arg10[%c72_100, %c176] : memref<144x256xf32, #tpu.memory_space<vmem>>, vector<8x16xf32>
    tpu.vector_store %arg10[%c72_100, %c176], %111 {strides = array<i32>} : memref<144x256xf32, #tpu.memory_space<vmem>>, vector<8x16xf32>,
    %c40_101 = arith.constant 40 : index
    %c0_102 = arith.constant 0 : index
    %113 = vector.load %arg11[%c40_101, %c0_102] : memref<64x16xf32, #tpu.memory_space<vmem>>, vector<8x16xf32>
    %cst_103 = arith.constant 4.000000e-01 : f32
    %114 = vector.broadcast %cst_103 : f32 to vector<8x16xf32>
    %115 = arith.mulf %114, %113 : vector<8x16xf32>
    %c48_104 = arith.constant 48 : index
    %c0_105 = arith.constant 0 : index
    %116 = vector.load %arg11[%c48_104, %c0_105] : memref<64x16xf32, #tpu.memory_space<vmem>>, vector<8x16xf32>
    %cst_106 = arith.constant 6.000000e-01 : f32
    %117 = vector.broadcast %cst_106 : f32 to vector<8x16xf32>
    %118 = arith.mulf %117, %116 : vector<8x16xf32>
    %119 = arith.addf %115, %118 : vector<8x16xf32>
    %c72_107 = arith.constant 72 : index
    %c192 = arith.constant 192 : index
    %120 = vector.load %arg10[%c72_107, %c192] : memref<144x256xf32, #tpu.memory_space<vmem>>, vector<8x16xf32>
    tpu.vector_store %arg10[%c72_107, %c192], %119 {strides = array<i32>} : memref<144x256xf32, #tpu.memory_space<vmem>>, vector<8x16xf32>,
    %c48_108 = arith.constant 48 : index
    %c0_109 = arith.constant 0 : index
    %121 = vector.load %arg11[%c48_108, %c0_109] : memref<64x16xf32, #tpu.memory_space<vmem>>, vector<8x16xf32>
    %cst_110 = arith.constant 0.933333337 : f32
    %122 = vector.broadcast %cst_110 : f32 to vector<8x16xf32>
    %123 = arith.mulf %122, %121 : vector<8x16xf32>
    %c56 = arith.constant 56 : index
    %c0_111 = arith.constant 0 : index
    %124 = vector.load %arg11[%c56, %c0_111] : memref<64x16xf32, #tpu.memory_space<vmem>>, vector<8x16xf32>
    %cst_112 = arith.constant 0.0666666701 : f32
    %125 = vector.broadcast %cst_112 : f32 to vector<8x16xf32>
    %126 = arith.mulf %125, %124 : vector<8x16xf32>
    %127 = arith.addf %123, %126 : vector<8x16xf32>
    %c72_113 = arith.constant 72 : index
    %c208 = arith.constant 208 : index
    %128 = vector.load %arg10[%c72_113, %c208] : memref<144x256xf32, #tpu.memory_space<vmem>>, vector<8x16xf32>
    tpu.vector_store %arg10[%c72_113, %c208], %127 {strides = array<i32>} : memref<144x256xf32, #tpu.memory_space<vmem>>, vector<8x16xf32>,
    %c48_114 = arith.constant 48 : index
    %c0_115 = arith.constant 0 : index
    %129 = vector.load %arg11[%c48_114, %c0_115] : memref<64x16xf32, #tpu.memory_space<vmem>>, vector<8x16xf32>
    %cst_116 = arith.constant 0.466666669 : f32
    %130 = vector.broadcast %cst_116 : f32 to vector<8x16xf32>
    %131 = arith.mulf %130, %129 : vector<8x16xf32>
    %c56_117 = arith.constant 56 : index
    %c0_118 = arith.constant 0 : index
    %132 = vector.load %arg11[%c56_117, %c0_118] : memref<64x16xf32, #tpu.memory_space<vmem>>, vector<8x16xf32>
    %cst_119 = arith.constant 0.533333361 : f32
    %133 = vector.broadcast %cst_119 : f32 to vector<8x16xf32>
    %134 = arith.mulf %133, %132 : vector<8x16xf32>
    %135 = arith.addf %131, %134 : vector<8x16xf32>
    %c72_120 = arith.constant 72 : index
    %c224 = arith.constant 224 : index
    %136 = vector.load %arg10[%c72_120, %c224] : memref<144x256xf32, #tpu.memory_space<vmem>>, vector<8x16xf32>
    tpu.vector_store %arg10[%c72_120, %c224], %135 {strides = array<i32>} : memref<144x256xf32, #tpu.memory_space<vmem>>, vector<8x16xf32>,
    %c48_121 = arith.constant 48 : index
    %c0_122 = arith.constant 0 : index
    %137 = vector.load %arg11[%c48_121, %c0_122] : memref<64x16xf32, #tpu.memory_space<vmem>>, vector<8x16xf32>
    %cst_123 = arith.constant 0.000000e+00 : f32
    %138 = vector.broadcast %cst_123 : f32 to vector<8x16xf32>
    %139 = arith.mulf %138, %137 : vector<8x16xf32>
    %c56_124 = arith.constant 56 : index
    %c0_125 = arith.constant 0 : index
    %140 = vector.load %arg11[%c56_124, %c0_125] : memref<64x16xf32, #tpu.memory_space<vmem>>, vector<8x16xf32>
    %cst_126 = arith.constant 1.000000e+00 : f32
    %141 = vector.broadcast %cst_126 : f32 to vector<8x16xf32>
    %142 = arith.mulf %141, %140 : vector<8x16xf32>
    %143 = arith.addf %139, %142 : vector<8x16xf32>
    %c72_127 = arith.constant 72 : index
    %c240 = arith.constant 240 : index
    %144 = vector.load %arg10[%c72_127, %c240] : memref<144x256xf32, #tpu.memory_space<vmem>>, vector<8x16xf32>
    tpu.vector_store %arg10[%c72_127, %c240], %143 {strides = array<i32>} : memref<144x256xf32, #tpu.memory_space<vmem>>, vector<8x16xf32>,
    %c0_128 = arith.constant 0 : index
    %c0_129 = arith.constant 0 : index
    %c0_130 = arith.constant 0 : index
    %145 = vector.load %arg1[%c0_128, %c0_129, %c0_130] : memref<1x4x256xf32, #tpu.memory_space<vmem>>, vector<1x4x256xf32>
    %146 = vector.shape_cast %145 : vector<1x4x256xf32> to vector<4x256xf32>
    %c17_i32 = arith.constant 17 : i32
    %147 = tpu.dynamic_rotate %146 by %c17_i32 dim 1 : vector<4x256xf32>, i32 -> vector<4x256xf32>
    %c0_131 = arith.constant 0 : index
    %c0_132 = arith.constant 0 : index
    %148 = vector.load %arg4[%c0_131, %c0_132] : memref<9x256xf32, #tpu.memory_space<vmem>>, vector<1x256xf32>
    %149 = vector.broadcast %148 : vector<1x256xf32> to vector<4x256xf32>
    %150 = arith.mulf %147, %149 : vector<4x256xf32>
    %c0_133 = arith.constant 0 : index
    %c0_134 = arith.constant 0 : index
    %151 = vector.load %arg10[%c0_133, %c0_134] : memref<144x256xf32, #tpu.memory_space<vmem>>, vector<4x256xf32>
    tpu.vector_store %arg10[%c0_133, %c0_134], %150 {strides = array<i32>} : memref<144x256xf32, #tpu.memory_space<vmem>>, vector<4x256xf32>,
    %c16_i32 = arith.constant 16 : i32
    %152 = tpu.dynamic_rotate %146 by %c16_i32 dim 1 : vector<4x256xf32>, i32 -> vector<4x256xf32>
    %c1 = arith.constant 1 : index
    %c0_135 = arith.constant 0 : index
    %153 = vector.load %arg4[%c1, %c0_135] : memref<9x256xf32, #tpu.memory_space<vmem>>, vector<1x256xf32>
    %154 = vector.broadcast %153 : vector<1x256xf32> to vector<4x256xf32>
    %155 = arith.mulf %152, %154 : vector<4x256xf32>
    %c16_136 = arith.constant 16 : index
    %c0_137 = arith.constant 0 : index
    %156 = vector.load %arg10[%c16_136, %c0_137] : memref<144x256xf32, #tpu.memory_space<vmem>>, vector<4x256xf32>
    tpu.vector_store %arg10[%c16_136, %c0_137], %155 {strides = array<i32>} : memref<144x256xf32, #tpu.memory_space<vmem>>, vector<4x256xf32>,
    %c15_i32 = arith.constant 15 : i32
    %157 = tpu.dynamic_rotate %146 by %c15_i32 dim 1 : vector<4x256xf32>, i32 -> vector<4x256xf32>
    %c2 = arith.constant 2 : index
    %c0_138 = arith.constant 0 : index
    %158 = vector.load %arg4[%c2, %c0_138] : memref<9x256xf32, #tpu.memory_space<vmem>>, vector<1x256xf32>
    %159 = vector.broadcast %158 : vector<1x256xf32> to vector<4x256xf32>
    %160 = arith.mulf %157, %159 : vector<4x256xf32>
    %c32_139 = arith.constant 32 : index
    %c0_140 = arith.constant 0 : index
    %161 = vector.load %arg10[%c32_139, %c0_140] : memref<144x256xf32, #tpu.memory_space<vmem>>, vector<4x256xf32>
    tpu.vector_store %arg10[%c32_139, %c0_140], %160 {strides = array<i32>} : memref<144x256xf32, #tpu.memory_space<vmem>>, vector<4x256xf32>,
    %c1_i32 = arith.constant 1 : i32
    %162 = tpu.dynamic_rotate %146 by %c1_i32 dim 1 : vector<4x256xf32>, i32 -> vector<4x256xf32>
    %c3 = arith.constant 3 : index
    %c0_141 = arith.constant 0 : index
    %163 = vector.load %arg4[%c3, %c0_141] : memref<9x256xf32, #tpu.memory_space<vmem>>, vector<1x256xf32>
    %164 = vector.broadcast %163 : vector<1x256xf32> to vector<4x256xf32>
    %165 = arith.mulf %162, %164 : vector<4x256xf32>
    %c48_142 = arith.constant 48 : index
    %c0_143 = arith.constant 0 : index
    %166 = vector.load %arg10[%c48_142, %c0_143] : memref<144x256xf32, #tpu.memory_space<vmem>>, vector<4x256xf32>
    tpu.vector_store %arg10[%c48_142, %c0_143], %165 {strides = array<i32>} : memref<144x256xf32, #tpu.memory_space<vmem>>, vector<4x256xf32>,
    %c64_144 = arith.constant 64 : index
    %c0_145 = arith.constant 0 : index
    %167 = vector.load %arg10[%c64_144, %c0_145] : memref<144x256xf32, #tpu.memory_space<vmem>>, vector<4x256xf32>
    tpu.vector_store %arg10[%c64_144, %c0_145], %146 {strides = array<i32>} : memref<144x256xf32, #tpu.memory_space<vmem>>, vector<4x256xf32>,
    %c255_i32 = arith.constant 255 : i32
    %168 = tpu.dynamic_rotate %146 by %c255_i32 dim 1 : vector<4x256xf32>, i32 -> vector<4x256xf32>
    %c5 = arith.constant 5 : index
    %c0_146 = arith.constant 0 : index
    %169 = vector.load %arg4[%c5, %c0_146] : memref<9x256xf32, #tpu.memory_space<vmem>>, vector<1x256xf32>
    %170 = vector.broadcast %169 : vector<1x256xf32> to vector<4x256xf32>
    %171 = arith.mulf %168, %170 : vector<4x256xf32>
    %c80_147 = arith.constant 80 : index
    %c0_148 = arith.constant 0 : index
    %172 = vector.load %arg10[%c80_147, %c0_148] : memref<144x256xf32, #tpu.memory_space<vmem>>, vector<4x256xf32>
    tpu.vector_store %arg10[%c80_147, %c0_148], %171 {strides = array<i32>} : memref<144x256xf32, #tpu.memory_space<vmem>>, vector<4x256xf32>,
    %c241_i32 = arith.constant 241 : i32
    %173 = tpu.dynamic_rotate %146 by %c241_i32 dim 1 : vector<4x256xf32>, i32 -> vector<4x256xf32>
    %c6 = arith.constant 6 : index
    %c0_149 = arith.constant 0 : index
    %174 = vector.load %arg4[%c6, %c0_149] : memref<9x256xf32, #tpu.memory_space<vmem>>, vector<1x256xf32>
    %175 = vector.broadcast %174 : vector<1x256xf32> to vector<4x256xf32>
    %176 = arith.mulf %173, %175 : vector<4x256xf32>
    %c96_150 = arith.constant 96 : index
    %c0_151 = arith.constant 0 : index
    %177 = vector.load %arg10[%c96_150, %c0_151] : memref<144x256xf32, #tpu.memory_space<vmem>>, vector<4x256xf32>
    tpu.vector_store %arg10[%c96_150, %c0_151], %176 {strides = array<i32>} : memref<144x256xf32, #tpu.memory_space<vmem>>, vector<4x256xf32>,
    %c240_i32 = arith.constant 240 : i32
    %178 = tpu.dynamic_rotate %146 by %c240_i32 dim 1 : vector<4x256xf32>, i32 -> vector<4x256xf32>
    %c7 = arith.constant 7 : index
    %c0_152 = arith.constant 0 : index
    %179 = vector.load %arg4[%c7, %c0_152] : memref<9x256xf32, #tpu.memory_space<vmem>>, vector<1x256xf32>
    %180 = vector.broadcast %179 : vector<1x256xf32> to vector<4x256xf32>
    %181 = arith.mulf %178, %180 : vector<4x256xf32>
    %c112_153 = arith.constant 112 : index
    %c0_154 = arith.constant 0 : index
    %182 = vector.load %arg10[%c112_153, %c0_154] : memref<144x256xf32, #tpu.memory_space<vmem>>, vector<4x256xf32>
    tpu.vector_store %arg10[%c112_153, %c0_154], %181 {strides = array<i32>} : memref<144x256xf32, #tpu.memory_space<vmem>>, vector<4x256xf32>,
    %c239_i32 = arith.constant 239 : i32
    %183 = tpu.dynamic_rotate %146 by %c239_i32 dim 1 : vector<4x256xf32>, i32 -> vector<4x256xf32>
    %c8_155 = arith.constant 8 : index
    %c0_156 = arith.constant 0 : index
    %184 = vector.load %arg4[%c8_155, %c0_156] : memref<9x256xf32, #tpu.memory_space<vmem>>, vector<1x256xf32>
    %185 = vector.broadcast %184 : vector<1x256xf32> to vector<4x256xf32>
    %186 = arith.mulf %183, %185 : vector<4x256xf32>
    %c128_157 = arith.constant 128 : index
    %c0_158 = arith.constant 0 : index
    %187 = vector.load %arg10[%c128_157, %c0_158] : memref<144x256xf32, #tpu.memory_space<vmem>>, vector<4x256xf32>
    tpu.vector_store %arg10[%c128_157, %c0_158], %186 {strides = array<i32>} : memref<144x256xf32, #tpu.memory_space<vmem>>, vector<4x256xf32>,
    %c72_159 = arith.constant 72 : index
    %c0_160 = arith.constant 0 : index
    %188 = vector.load %arg10[%c72_159, %c0_160] : memref<144x256xf32, #tpu.memory_space<vmem>>, vector<8x256xf32>
    %c17_i32_161 = arith.constant 17 : i32
    %189 = tpu.dynamic_rotate %188 by %c17_i32_161 dim 1 : vector<8x256xf32>, i32 -> vector<8x256xf32>
    %c0_162 = arith.constant 0 : index
    %c0_163 = arith.constant 0 : index
    %190 = vector.load %arg4[%c0_162, %c0_163] : memref<9x256xf32, #tpu.memory_space<vmem>>, vector<1x256xf32>
    %191 = vector.broadcast %190 : vector<1x256xf32> to vector<8x256xf32>
    %192 = arith.mulf %189, %191 : vector<8x256xf32>
    %c8_164 = arith.constant 8 : index
    %c0_165 = arith.constant 0 : index
    %193 = vector.load %arg10[%c8_164, %c0_165] : memref<144x256xf32, #tpu.memory_space<vmem>>, vector<8x256xf32>
    tpu.vector_store %arg10[%c8_164, %c0_165], %192 {strides = array<i32>} : memref<144x256xf32, #tpu.memory_space<vmem>>, vector<8x256xf32>,
    %c16_i32_166 = arith.constant 16 : i32
    %194 = tpu.dynamic_rotate %188 by %c16_i32_166 dim 1 : vector<8x256xf32>, i32 -> vector<8x256xf32>
    %c1_167 = arith.constant 1 : index
    %c0_168 = arith.constant 0 : index
    %195 = vector.load %arg4[%c1_167, %c0_168] : memref<9x256xf32, #tpu.memory_space<vmem>>, vector<1x256xf32>
    %196 = vector.broadcast %195 : vector<1x256xf32> to vector<8x256xf32>
    %197 = arith.mulf %194, %196 : vector<8x256xf32>
    %c24_169 = arith.constant 24 : index
    %c0_170 = arith.constant 0 : index
    %198 = vector.load %arg10[%c24_169, %c0_170] : memref<144x256xf32, #tpu.memory_space<vmem>>, vector<8x256xf32>
    tpu.vector_store %arg10[%c24_169, %c0_170], %197 {strides = array<i32>} : memref<144x256xf32, #tpu.memory_space<vmem>>, vector<8x256xf32>,
    %c15_i32_171 = arith.constant 15 : i32
    %199 = tpu.dynamic_rotate %188 by %c15_i32_171 dim 1 : vector<8x256xf32>, i32 -> vector<8x256xf32>
    %c2_172 = arith.constant 2 : index
    %c0_173 = arith.constant 0 : index
    %200 = vector.load %arg4[%c2_172, %c0_173] : memref<9x256xf32, #tpu.memory_space<vmem>>, vector<1x256xf32>
    %201 = vector.broadcast %200 : vector<1x256xf32> to vector<8x256xf32>
    %202 = arith.mulf %199, %201 : vector<8x256xf32>
    %c40_174 = arith.constant 40 : index
    %c0_175 = arith.constant 0 : index
    %203 = vector.load %arg10[%c40_174, %c0_175] : memref<144x256xf32, #tpu.memory_space<vmem>>, vector<8x256xf32>
    tpu.vector_store %arg10[%c40_174, %c0_175], %202 {strides = array<i32>} : memref<144x256xf32, #tpu.memory_space<vmem>>, vector<8x256xf32>,
    %c1_i32_176 = arith.constant 1 : i32
    %204 = tpu.dynamic_rotate %188 by %c1_i32_176 dim 1 : vector<8x256xf32>, i32 -> vector<8x256xf32>
    %c3_177 = arith.constant 3 : index
    %c0_178 = arith.constant 0 : index
    %205 = vector.load %arg4[%c3_177, %c0_178] : memref<9x256xf32, #tpu.memory_space<vmem>>, vector<1x256xf32>
    %206 = vector.broadcast %205 : vector<1x256xf32> to vector<8x256xf32>
    %207 = arith.mulf %204, %206 : vector<8x256xf32>
    %c56_179 = arith.constant 56 : index
    %c0_180 = arith.constant 0 : index
    %208 = vector.load %arg10[%c56_179, %c0_180] : memref<144x256xf32, #tpu.memory_space<vmem>>, vector<8x256xf32>
    tpu.vector_store %arg10[%c56_179, %c0_180], %207 {strides = array<i32>} : memref<144x256xf32, #tpu.memory_space<vmem>>, vector<8x256xf32>,
    %c255_i32_181 = arith.constant 255 : i32
    %209 = tpu.dynamic_rotate %188 by %c255_i32_181 dim 1 : vector<8x256xf32>, i32 -> vector<8x256xf32>
    %c5_182 = arith.constant 5 : index
    %c0_183 = arith.constant 0 : index
    %210 = vector.load %arg4[%c5_182, %c0_183] : memref<9x256xf32, #tpu.memory_space<vmem>>, vector<1x256xf32>
    %211 = vector.broadcast %210 : vector<1x256xf32> to vector<8x256xf32>
    %212 = arith.mulf %209, %211 : vector<8x256xf32>
    %c88 = arith.constant 88 : index
    %c0_184 = arith.constant 0 : index
    %213 = vector.load %arg10[%c88, %c0_184] : memref<144x256xf32, #tpu.memory_space<vmem>>, vector<8x256xf32>
    tpu.vector_store %arg10[%c88, %c0_184], %212 {strides = array<i32>} : memref<144x256xf32, #tpu.memory_space<vmem>>, vector<8x256xf32>,
    %c241_i32_185 = arith.constant 241 : i32
    %214 = tpu.dynamic_rotate %188 by %c241_i32_185 dim 1 : vector<8x256xf32>, i32 -> vector<8x256xf32>
    %c6_186 = arith.constant 6 : index
    %c0_187 = arith.constant 0 : index
    %215 = vector.load %arg4[%c6_186, %c0_187] : memref<9x256xf32, #tpu.memory_space<vmem>>, vector<1x256xf32>
    %216 = vector.broadcast %215 : vector<1x256xf32> to vector<8x256xf32>
    %217 = arith.mulf %214, %216 : vector<8x256xf32>
    %c104 = arith.constant 104 : index
    %c0_188 = arith.constant 0 : index
    %218 = vector.load %arg10[%c104, %c0_188] : memref<144x256xf32, #tpu.memory_space<vmem>>, vector<8x256xf32>
    tpu.vector_store %arg10[%c104, %c0_188], %217 {strides = array<i32>} : memref<144x256xf32, #tpu.memory_space<vmem>>, vector<8x256xf32>,
    %c240_i32_189 = arith.constant 240 : i32
    %219 = tpu.dynamic_rotate %188 by %c240_i32_189 dim 1 : vector<8x256xf32>, i32 -> vector<8x256xf32>
    %c7_190 = arith.constant 7 : index
    %c0_191 = arith.constant 0 : index
    %220 = vector.load %arg4[%c7_190, %c0_191] : memref<9x256xf32, #tpu.memory_space<vmem>>, vector<1x256xf32>
    %221 = vector.broadcast %220 : vector<1x256xf32> to vector<8x256xf32>
    %222 = arith.mulf %219, %221 : vector<8x256xf32>
    %c120 = arith.constant 120 : index
    %c0_192 = arith.constant 0 : index
    %223 = vector.load %arg10[%c120, %c0_192] : memref<144x256xf32, #tpu.memory_space<vmem>>, vector<8x256xf32>
    tpu.vector_store %arg10[%c120, %c0_192], %222 {strides = array<i32>} : memref<144x256xf32, #tpu.memory_space<vmem>>, vector<8x256xf32>,
    %c239_i32_193 = arith.constant 239 : i32
    %224 = tpu.dynamic_rotate %188 by %c239_i32_193 dim 1 : vector<8x256xf32>, i32 -> vector<8x256xf32>
    %c8_194 = arith.constant 8 : index
    %c0_195 = arith.constant 0 : index
    %225 = vector.load %arg4[%c8_194, %c0_195] : memref<9x256xf32, #tpu.memory_space<vmem>>, vector<1x256xf32>
    %226 = vector.broadcast %225 : vector<1x256xf32> to vector<8x256xf32>
    %227 = arith.mulf %224, %226 : vector<8x256xf32>
    %c136 = arith.constant 136 : index
    %c0_196 = arith.constant 0 : index
    %228 = vector.load %arg10[%c136, %c0_196] : memref<144x256xf32, #tpu.memory_space<vmem>>, vector<8x256xf32>
    tpu.vector_store %arg10[%c136, %c0_196], %227 {strides = array<i32>} : memref<144x256xf32, #tpu.memory_space<vmem>>, vector<8x256xf32>,
    %c0_197 = arith.constant 0 : index
    %c0_198 = arith.constant 0 : index
    %229 = vector.load %arg5[%c0_197, %c0_198] : memref<16x144xf32, #tpu.memory_space<vmem>>, vector<16x144xf32>
    %c0_199 = arith.constant 0 : index
    %c0_200 = arith.constant 0 : index
    %230 = vector.load %arg10[%c0_199, %c0_200] : memref<144x256xf32, #tpu.memory_space<vmem>>, vector<144x256xf32>
    %cst_201 = arith.constant dense<0.000000e+00> : vector<16x256xf32>
    %231 = tpu.matmul %229, %230, %cst_201 {dimension_numbers = #tpu.dot_dimension_numbers<[1], [0], [0], [1], [0, 0, 1, 1], [], []>} : vector<16x144xf32>, vector<144x256xf32>, vector<16x256xf32> -> vector<16x256xf32>
    %232 = vector.extract_strided_slice %231 {offsets = [0, 0], sizes = [4, 256], strides = [1, 1]} : vector<16x256xf32> to vector<4x256xf32>
    %c0_202 = arith.constant 0 : index
    %c0_203 = arith.constant 0 : index
    %233 = vector.load %arg6[%c0_202, %c0_203] : memref<4x1xf32, #tpu.memory_space<vmem>>, vector<4x1xf32>
    %234 = vector.broadcast %233 : vector<4x1xf32> to vector<4x256xf32>
    %235 = arith.addf %232, %234 : vector<4x256xf32>
    %cst_204 = arith.constant 0.000000e+00 : f32
    %236 = vector.broadcast %cst_204 : f32 to vector<4x256xf32>
    %237 = arith.cmpf oge, %235, %236 : vector<4x256xf32>
    %cst_205 = arith.constant 2.000000e-01 : f32
    %238 = vector.broadcast %cst_205 : f32 to vector<4x256xf32>
    %239 = arith.mulf %238, %235 : vector<4x256xf32>
    %240 = arith.select %237, %235, %239 : vector<4x256xi1>, vector<4x256xf32>
    %241 = vector.extract_strided_slice %231 {offsets = [8, 0], sizes = [4, 256], strides = [1, 1]} : vector<16x256xf32> to vector<4x256xf32>
    %c0_206 = arith.constant 0 : index
    %c0_207 = arith.constant 0 : index
    %c0_208 = arith.constant 0 : index
    %242 = vector.load %arg9[%c0_206, %c0_207, %c0_208] : memref<1x4x256xf32, #tpu.memory_space<vmem>>, vector<1x4x256xf32>
    %243 = vector.shape_cast %242 : vector<1x4x256xf32> to vector<4x256xf32>
    %244 = vector.shape_cast %241 : vector<4x256xf32> to vector<1x4x256xf32>
    tpu.vector_store %arg9[%c0_206, %c0_207, %c0_208], %244 {strides = array<i32>} : memref<1x4x256xf32, #tpu.memory_space<vmem>>, vector<1x4x256xf32>,
    %c17_i32_209 = arith.constant 17 : i32
    %245 = tpu.dynamic_rotate %240 by %c17_i32_209 dim 1 : vector<4x256xf32>, i32 -> vector<4x256xf32>
    %c0_210 = arith.constant 0 : index
    %c0_211 = arith.constant 0 : index
    %246 = vector.load %arg4[%c0_210, %c0_211] : memref<9x256xf32, #tpu.memory_space<vmem>>, vector<1x256xf32>
    %247 = vector.broadcast %246 : vector<1x256xf32> to vector<4x256xf32>
    %248 = arith.mulf %245, %247 : vector<4x256xf32>
    %c0_212 = arith.constant 0 : index
    %c0_213 = arith.constant 0 : index
    %249 = vector.load %arg10[%c0_212, %c0_213] : memref<144x256xf32, #tpu.memory_space<vmem>>, vector<4x256xf32>
    tpu.vector_store %arg10[%c0_212, %c0_213], %248 {strides = array<i32>} : memref<144x256xf32, #tpu.memory_space<vmem>>, vector<4x256xf32>,
    %c16_i32_214 = arith.constant 16 : i32
    %250 = tpu.dynamic_rotate %240 by %c16_i32_214 dim 1 : vector<4x256xf32>, i32 -> vector<4x256xf32>
    %c1_215 = arith.constant 1 : index
    %c0_216 = arith.constant 0 : index
    %251 = vector.load %arg4[%c1_215, %c0_216] : memref<9x256xf32, #tpu.memory_space<vmem>>, vector<1x256xf32>
    %252 = vector.broadcast %251 : vector<1x256xf32> to vector<4x256xf32>
    %253 = arith.mulf %250, %252 : vector<4x256xf32>
    %c8_217 = arith.constant 8 : index
    %c0_218 = arith.constant 0 : index
    %254 = vector.load %arg10[%c8_217, %c0_218] : memref<144x256xf32, #tpu.memory_space<vmem>>, vector<4x256xf32>
    tpu.vector_store %arg10[%c8_217, %c0_218], %253 {strides = array<i32>} : memref<144x256xf32, #tpu.memory_space<vmem>>, vector<4x256xf32>,
    %c15_i32_219 = arith.constant 15 : i32
    %255 = tpu.dynamic_rotate %240 by %c15_i32_219 dim 1 : vector<4x256xf32>, i32 -> vector<4x256xf32>
    %c2_220 = arith.constant 2 : index
    %c0_221 = arith.constant 0 : index
    %256 = vector.load %arg4[%c2_220, %c0_221] : memref<9x256xf32, #tpu.memory_space<vmem>>, vector<1x256xf32>
    %257 = vector.broadcast %256 : vector<1x256xf32> to vector<4x256xf32>
    %258 = arith.mulf %255, %257 : vector<4x256xf32>
    %c16_222 = arith.constant 16 : index
    %c0_223 = arith.constant 0 : index
    %259 = vector.load %arg10[%c16_222, %c0_223] : memref<144x256xf32, #tpu.memory_space<vmem>>, vector<4x256xf32>
    tpu.vector_store %arg10[%c16_222, %c0_223], %258 {strides = array<i32>} : memref<144x256xf32, #tpu.memory_space<vmem>>, vector<4x256xf32>,
    %c1_i32_224 = arith.constant 1 : i32
    %260 = tpu.dynamic_rotate %240 by %c1_i32_224 dim 1 : vector<4x256xf32>, i32 -> vector<4x256xf32>
    %c3_225 = arith.constant 3 : index
    %c0_226 = arith.constant 0 : index
    %261 = vector.load %arg4[%c3_225, %c0_226] : memref<9x256xf32, #tpu.memory_space<vmem>>, vector<1x256xf32>
    %262 = vector.broadcast %261 : vector<1x256xf32> to vector<4x256xf32>
    %263 = arith.mulf %260, %262 : vector<4x256xf32>
    %c24_227 = arith.constant 24 : index
    %c0_228 = arith.constant 0 : index
    %264 = vector.load %arg10[%c24_227, %c0_228] : memref<144x256xf32, #tpu.memory_space<vmem>>, vector<4x256xf32>
    tpu.vector_store %arg10[%c24_227, %c0_228], %263 {strides = array<i32>} : memref<144x256xf32, #tpu.memory_space<vmem>>, vector<4x256xf32>,
    %c32_229 = arith.constant 32 : index
    %c0_230 = arith.constant 0 : index
    %265 = vector.load %arg10[%c32_229, %c0_230] : memref<144x256xf32, #tpu.memory_space<vmem>>, vector<4x256xf32>
    tpu.vector_store %arg10[%c32_229, %c0_230], %240 {strides = array<i32>} : memref<144x256xf32, #tpu.memory_space<vmem>>, vector<4x256xf32>,
    %c255_i32_231 = arith.constant 255 : i32
    %266 = tpu.dynamic_rotate %240 by %c255_i32_231 dim 1 : vector<4x256xf32>, i32 -> vector<4x256xf32>
    %c5_232 = arith.constant 5 : index
    %c0_233 = arith.constant 0 : index
    %267 = vector.load %arg4[%c5_232, %c0_233] : memref<9x256xf32, #tpu.memory_space<vmem>>, vector<1x256xf32>
    %268 = vector.broadcast %267 : vector<1x256xf32> to vector<4x256xf32>
    %269 = arith.mulf %266, %268 : vector<4x256xf32>
    %c40_234 = arith.constant 40 : index
    %c0_235 = arith.constant 0 : index
    %270 = vector.load %arg10[%c40_234, %c0_235] : memref<144x256xf32, #tpu.memory_space<vmem>>, vector<4x256xf32>
    tpu.vector_store %arg10[%c40_234, %c0_235], %269 {strides = array<i32>} : memref<144x256xf32, #tpu.memory_space<vmem>>, vector<4x256xf32>,
    %c241_i32_236 = arith.constant 241 : i32
    %271 = tpu.dynamic_rotate %240 by %c241_i32_236 dim 1 : vector<4x256xf32>, i32 -> vector<4x256xf32>
    %c6_237 = arith.constant 6 : index
    %c0_238 = arith.constant 0 : index
    %272 = vector.load %arg4[%c6_237, %c0_238] : memref<9x256xf32, #tpu.memory_space<vmem>>, vector<1x256xf32>
    %273 = vector.broadcast %272 : vector<1x256xf32> to vector<4x256xf32>
    %274 = arith.mulf %271, %273 : vector<4x256xf32>
    %c48_239 = arith.constant 48 : index
    %c0_240 = arith.constant 0 : index
    %275 = vector.load %arg10[%c48_239, %c0_240] : memref<144x256xf32, #tpu.memory_space<vmem>>, vector<4x256xf32>
    tpu.vector_store %arg10[%c48_239, %c0_240], %274 {strides = array<i32>} : memref<144x256xf32, #tpu.memory_space<vmem>>, vector<4x256xf32>,
    %c240_i32_241 = arith.constant 240 : i32
    %276 = tpu.dynamic_rotate %240 by %c240_i32_241 dim 1 : vector<4x256xf32>, i32 -> vector<4x256xf32>
    %c7_242 = arith.constant 7 : index
    %c0_243 = arith.constant 0 : index
    %277 = vector.load %arg4[%c7_242, %c0_243] : memref<9x256xf32, #tpu.memory_space<vmem>>, vector<1x256xf32>
    %278 = vector.broadcast %277 : vector<1x256xf32> to vector<4x256xf32>
    %279 = arith.mulf %276, %278 : vector<4x256xf32>
    %c56_244 = arith.constant 56 : index
    %c0_245 = arith.constant 0 : index
    %280 = vector.load %arg10[%c56_244, %c0_245] : memref<144x256xf32, #tpu.memory_space<vmem>>, vector<4x256xf32>
    tpu.vector_store %arg10[%c56_244, %c0_245], %279 {strides = array<i32>} : memref<144x256xf32, #tpu.memory_space<vmem>>, vector<4x256xf32>,
    %c239_i32_246 = arith.constant 239 : i32
    %281 = tpu.dynamic_rotate %240 by %c239_i32_246 dim 1 : vector<4x256xf32>, i32 -> vector<4x256xf32>
    %c8_247 = arith.constant 8 : index
    %c0_248 = arith.constant 0 : index
    %282 = vector.load %arg4[%c8_247, %c0_248] : memref<9x256xf32, #tpu.memory_space<vmem>>, vector<1x256xf32>
    %283 = vector.broadcast %282 : vector<1x256xf32> to vector<4x256xf32>
    %284 = arith.mulf %281, %283 : vector<4x256xf32>
    %c64_249 = arith.constant 64 : index
    %c0_250 = arith.constant 0 : index
    %285 = vector.load %arg10[%c64_249, %c0_250] : memref<144x256xf32, #tpu.memory_space<vmem>>, vector<4x256xf32>
    tpu.vector_store %arg10[%c64_249, %c0_250], %284 {strides = array<i32>} : memref<144x256xf32, #tpu.memory_space<vmem>>, vector<4x256xf32>,
    %c0_251 = arith.constant 0 : index
    %c0_252 = arith.constant 0 : index
    %286 = vector.load %arg7[%c0_251, %c0_252] : memref<8x72xf32, #tpu.memory_space<vmem>>, vector<8x72xf32>
    %c0_253 = arith.constant 0 : index
    %c0_254 = arith.constant 0 : index
    %287 = vector.load %arg10[%c0_253, %c0_254] : memref<144x256xf32, #tpu.memory_space<vmem>>, vector<72x256xf32>
    %cst_255 = arith.constant dense<0.000000e+00> : vector<8x256xf32>
    %288 = tpu.matmul %286, %287, %cst_255 {dimension_numbers = #tpu.dot_dimension_numbers<[1], [0], [0], [1], [0, 0, 1, 1], [], []>} : vector<8x72xf32>, vector<72x256xf32>, vector<8x256xf32> -> vector<8x256xf32>
    %289 = vector.extract_strided_slice %288 {offsets = [0, 0], sizes = [4, 256], strides = [1, 1]} : vector<8x256xf32> to vector<4x256xf32>
    %c0_256 = arith.constant 0 : index
    %c0_257 = arith.constant 0 : index
    %290 = vector.load %arg8[%c0_256, %c0_257] : memref<4x1xf32, #tpu.memory_space<vmem>>, vector<4x1xf32>
    %291 = vector.broadcast %290 : vector<4x1xf32> to vector<4x256xf32>
    %292 = arith.addf %289, %291 : vector<4x256xf32>
    %c0_258 = arith.constant 0 : index
    %c0_259 = arith.constant 0 : index
    %c0_260 = arith.constant 0 : index
    %293 = vector.load %arg9[%c0_258, %c0_259, %c0_260] : memref<1x4x256xf32, #tpu.memory_space<vmem>>, vector<1x4x256xf32>
    %294 = vector.shape_cast %293 : vector<1x4x256xf32> to vector<4x256xf32>
    %295 = arith.addf %292, %294 : vector<4x256xf32>
    %cst_261 = arith.constant 0.000000e+00 : f32
    %296 = vector.broadcast %cst_261 : f32 to vector<4x256xf32>
    %297 = arith.cmpf oge, %295, %296 : vector<4x256xf32>
    %cst_262 = arith.constant 2.000000e-01 : f32
    %298 = vector.broadcast %cst_262 : f32 to vector<4x256xf32>
    %299 = arith.mulf %298, %295 : vector<4x256xf32>
    %300 = arith.select %297, %295, %299 : vector<4x256xi1>, vector<4x256xf32>
    %c0_263 = arith.constant 0 : index
    %c0_264 = arith.constant 0 : index
    %c0_265 = arith.constant 0 : index
    %301 = vector.load %arg9[%c0_263, %c0_264, %c0_265] : memref<1x4x256xf32, #tpu.memory_space<vmem>>, vector<1x4x256xf32>
    %302 = vector.shape_cast %301 : vector<1x4x256xf32> to vector<4x256xf32>
    %303 = vector.shape_cast %300 : vector<4x256xf32> to vector<1x4x256xf32>
    tpu.vector_store %arg9[%c0_263, %c0_264, %c0_265], %303 {strides = array<i32>} : memref<1x4x256xf32, #tpu.memory_space<vmem>>, vector<1x4x256xf32>,
    return
  }
  func.func @transform_0(%arg0: i32) -> (i32, i32, i32) {
    %c0_i32 = arith.constant 0 : i32
    %c0_i32_0 = arith.constant 0 : i32
    %c0_i32_1 = arith.constant 0 : i32
    return %arg0, %c0_i32, %c0_i32_0 : i32, i32, i32
  }
  func.func @transform_1(%arg0: i32) -> (i32, i32, i32) {
    %c0_i32 = arith.constant 0 : i32
    %c0_i32_0 = arith.constant 0 : i32
    %c0_i32_1 = arith.constant 0 : i32
    return %arg0, %c0_i32, %c0_i32_0 : i32, i32, i32
  }
  func.func @transform_2(%arg0: i32) -> (i32, i32) {
    %c0_i32 = arith.constant 0 : i32
    %c0_i32_0 = arith.constant 0 : i32
    %c0_i32_1 = arith.constant 0 : i32
    return %c0_i32, %c0_i32_0 : i32, i32
  }
  func.func @transform_3(%arg0: i32) -> (i32, i32) {
    %c0_i32 = arith.constant 0 : i32
    %c0_i32_0 = arith.constant 0 : i32
    %c0_i32_1 = arith.constant 0 : i32
    return %c0_i32, %c0_i32_0 : i32, i32
  }
  func.func @transform_4(%arg0: i32) -> (i32, i32) {
    %c0_i32 = arith.constant 0 : i32
    %c0_i32_0 = arith.constant 0 : i32
    %c0_i32_1 = arith.constant 0 : i32
    return %c0_i32, %c0_i32_0 : i32, i32
  }
  func.func @transform_5(%arg0: i32) -> (i32, i32) {
    %c0_i32 = arith.constant 0 : i32
    %c0_i32_0 = arith.constant 0 : i32
    %c0_i32_1 = arith.constant 0 : i32
    return %c0_i32, %c0_i32_0 : i32, i32
  }
  func.func @transform_6(%arg0: i32) -> (i32, i32) {
    %c0_i32 = arith.constant 0 : i32
    %c0_i32_0 = arith.constant 0 : i32
    %c0_i32_1 = arith.constant 0 : i32
    return %c0_i32, %c0_i32_0 : i32, i32
  }
  func.func @transform_7(%arg0: i32) -> (i32, i32) {
    %c0_i32 = arith.constant 0 : i32
    %c0_i32_0 = arith.constant 0 : i32
    %c0_i32_1 = arith.constant 0 : i32
    return %c0_i32, %c0_i32_0 : i32, i32
  }
  func.func @transform_8(%arg0: i32) -> (i32, i32, i32) {
    %c0_i32 = arith.constant 0 : i32
    %c0_i32_0 = arith.constant 0 : i32
    %c0_i32_1 = arith.constant 0 : i32
    return %arg0, %c0_i32, %c0_i32_0 : i32, i32, i32
  }
}

</mosaic_0001>

<bundles_post_ra>
// kernel: decoder_forward.1
= control target key start
LH: loop header
LB: loop body
LE: loop exit
PB: predicated region body
PF: predicated region fallthrough
CT: control target
= control target key end

     0   :  { %s1745_s27 = smov 0   ;;  %s2161_s0 = inlined_call_operand.vmem [shape: f32[2,4,256], index: 0, kind: input, shape index: {}]   ;;  %s2162_s1 = inlined_call_operand.vmem [shape: f32[2,64,8], index: 1, kind: input, shape index: {}]   ;;  %s2163_s2 = inlined_call_operand.vmem [shape: f32[8,16], index: 2, kind: input, shape index: {}]   ;;  %s2164_s3 = inlined_call_operand.vmem [shape: f32[9,256], index: 3, kind: input, shape index: {}]   ;;  %s2165_s4 = inlined_call_operand.vmem [shape: f32[16,144], index: 4, kind: input, shape index: {}]   ;;  %s2166_s5 = inlined_call_operand.vmem [shape: f32[4,1], index: 5, kind: input, shape index: {}]   ;;  %s2167_s6 = inlined_call_operand.vmem [shape: f32[8,72], index: 6, kind: input, shape index: {}]   ;;  %s2168_s7 = inlined_call_operand.vmem [shape: f32[4,1], index: 7, kind: input, shape index: {}]   ;;  %s2169_s8 = inlined_call_operand.vmem [shape: f32[2,4,256], index: 8, kind: output, shape index: {}]  }
   0x1 LB: > { %s1529_s28 = sadd.s32 4294967295, %s1683_s27   ;;  %p1533_p0 = scmp.ge.s32.totalorder %s1683_s27, 1  ;;  %s1683_s27 = sphi %s1745_s27, %s18_s27  }
   0x2   : > { %p272_p1 = scmp.lt.s32.totalorder %s1683_s27, 3 }
   0x4   : > { %p273_p2 = pnand %p1533_p0, %p272_p1 }
   0x5   : > { %v352_v0 = vld [vmem:[%s2163_s2] sm:$0xff] (!%p273_p2)  ;;  %p311_p3 = scmp.lt.s32.totalorder (!%p273_p2), %s1529_s28, 1  ;;  %vm353_vm0 = vcmask (!%p273_p2), 64512   ;;  %vm483_vm1 = vcmask (!%p273_p2), 130048   ;;  %s1685_s17 = smov (!%p273_p2), 32   ;;  %v1690_v61 = vmov (!%p273_p2), 0.0  }
   0x6   : > { %276 = sbr.rel (%p273_p2) target bundleno = 1152 (0x480), region = 52  ;;  %1586 = vmatprep.subr.mxu0 (!%p273_p2), %v352_v0  ;;  %s1686_s18 = smov (!%p273_p2), 16   ;;  %327 = vst [vmem:[#allocation2 + $0x8] sm:$0xf0] (!%p273_p2), %v1690_v61  ;;  %326 = vst [vmem:[#allocation2] sm:$0xf0] (!%p273_p2), %v1690_v61 }
   0x7   : > { %1587 = vmatpush3.msra.mxu0 (!%p273_p2), %v352_v0  ;;  %s1687_s19 = smov (!%p273_p2), 48   ;;  %s1688_s20 = smov (!%p273_p2), 64   ;;  %328 = vst [vmem:[#allocation2 + $0x20] sm:$0xf0] (!%p273_p2), %v1690_v61  ;;  %329 = vst [vmem:[#allocation2 + $0x28] sm:$0xf0] (!%p273_p2), %v1690_v61 }
   0x8   : > { %s1689_s21 = smov (!%p273_p2), 80   ;;  %330 = vst [vmem:[#allocation2 + $0x40] sm:$0xf0] (!%p273_p2), %v1690_v61  ;;  %331 = vst [vmem:[#allocation2 + $0x48] sm:$0xf0] (!%p273_p2), %v1690_v61  ;;  %s1691_s22 = smov (!%p273_p2), 96  }
   0x9   : > { %332 = vst [vmem:[#allocation2 + $0x60] sm:$0xf0] (!%p273_p2), %v1690_v61  ;;  %333 = vst [vmem:[#allocation2 + $0x68] sm:$0xf0] (!%p273_p2), %v1690_v61  ;;  %s1692_s23 = smov (!%p273_p2), 112   ;;  %s1693_s24 = smov (!%p273_p2), 17  }
   0xa   : > { %334 = vst [vmem:[#allocation2 + $0x80] sm:$0xf0] (!%p273_p2), %v1690_v61  ;;  %335 = vst [vmem:[#allocation2 + $0x88] sm:$0xf0] (!%p273_p2), %v1690_v61  ;;  %s1694_s25 = smov (!%p273_p2), 15   ;;  %s1695_s26 = smov (!%p273_p2), 1  }
   0xb   : > { %336 = vst [vmem:[#allocation2 + $0xa0] sm:$0xf0] (!%p273_p2), %v1690_v61  ;;  %337 = vst [vmem:[#allocation2 + $0xa8] sm:$0xf0] (!%p273_p2), %v1690_v61  ;;  %s1696_s29 = smov (!%p273_p2), 127   ;;  %s1697_s30 = smov (!%p273_p2), 113  }
   0xc   : > { %338 = vst [vmem:[#allocation2 + $0xc0] sm:$0xf0] (!%p273_p2), %v1690_v61  ;;  %339 = vst [vmem:[#allocation2 + $0xc8] sm:$0xf0] (!%p273_p2), %v1690_v61  ;;  %vm503_vm2 = vcmask (!%p273_p2), 261248   ;;  %vm514_vm3 = vcmask (!%p273_p2), 392448  }
   0xd   : > { %s2171_s28 = smov (!%p311_p3, %s1529_s28), 1  ;;  %340 = vst [vmem:[#allocation2 + $0xe0] sm:$0xf0] %v1690_v61  ;;  %341 = vst [vmem:[#allocation2 + $0xe8] sm:$0xf0] %v1690_v61  ;;  %vm525_vm4 = vcmask 523648  }
   0xe   : > { %s1574_s9 = sshll.u32 %s2171_s28, 3  ;;  %s1575_s10 = sshll.u32 %s2171_s28, 6  ;;  %342 = vst [vmem:[#allocation2 + $0x100] sm:$0xf0] %v1690_v61  ;;  %343 = vst [vmem:[#allocation2 + $0x108] sm:$0xf0] %v1690_v61 }
   0xf   : > { %s315_s13 = scalar_lea.vmem %s2161_s0, %s1574_s9  ;;  %s320_s16 = scalar_lea.vmem %s2162_s1, %s1575_s10  ;;  %vm536_vm5 = vcmask 654848   ;;  %vm547_vm6 = vcmask 786048   ;;  %vm558_vm7 = vcmask 917248   ;;  %vm569_vm8 = vcmask 1048448  }
  0x10   : > { %v344_v1 = vld [vmem:[%s320_s16] sm:$0xff]  ;;  %v345_v3 = vld [vmem:[%s320_s16 + $0x8] sm:$0xff]  ;;  %v346_v4 = vld [vmem:[%s320_s16 + $0x10] sm:$0xff]  ;;  %s1698_s10 = smov 111  }
  0x11   : > { %v1768_v2 = vld [vmem:[%s315_s13] sm:$0xff]  ;;  %1588 = vmatprep.mubr.msk.f32.mxu0 %vm353_vm0, %v344_v1  ;;  %v347_v5 = vld [vmem:[%s320_s16 + $0x18] sm:$0xff]  ;;  %v349_v7 = vld [vmem:[%s320_s16 + $0x28] sm:$0xff] }
  0x12   : > { %747 = vst [vmem:[#allocation2 + $0x80] sm:$0xf] %v1768_v2  ;;  %1589 = vmatmul.mubr.msk.f32.vlgmr.msra.gmra.mrb[0].mxu0 %vm353_vm0, %v345_v3  ;;  %v348_v6 = vld [vmem:[%s320_s16 + $0x20] sm:$0xff]  ;;  %v350_v8 = vld [vmem:[%s320_s16 + $0x30] sm:$0xff]  ;;  %v351_v9 = vld [vmem:[%s320_s16 + $0x38] sm:$0xff]  ;;  %v1786_v20 = vcombine.high %v1768_v2, %v1768_v2 }
  0x13   : > { %1591 = vmatprep.mubr.msk.f32.mxu0 %vm353_vm0, %v346_v4 }
  0x14   : > { %748 = vst [vmem:[#allocation2 + $0x88] sm:$0xf] %v1786_v20 }
  0x16   : > { %1592 = vmatmul.mubr.msk.f32.gmra.mrb[2].mxu0 %vm353_vm0, %v347_v5 }
  0x17   : > { %1594 = vmatprep.mubr.msk.f32.mxu0 %vm353_vm0, %v348_v6 }
  0x1a   : > { %1595 = vmatmul.mubr.msk.f32.gmra.mrb[4].mxu0 %vm353_vm0, %v349_v7 }
  0x1b   : > { %1597 = vmatprep.mubr.msk.f32.mxu0 %vm353_vm0, %v350_v8 }
  0x1e   : > { %1598 = vmatmul.mubr.msk.f32.gmra.mrb[6].mxu0 %vm353_vm0, %v351_v9 }
  0x1f   : > { %1430 = vmatprep.mubr.f32.mxu0 %v1690_v61 }
  0xe5   : > { %v1590_v10 = vpop.f32.mrb[0].mxu0 }
  0xe6   : > { %485 = vst.msk [vmem:[#allocation3 + $0x8] sm:$0xff] %vm483_vm1, %v1590_v10  ;;  %v444_v11 = vpop.f32.mrb[1].mxu0 }
  0xe7   : > { %484 = vst.msk [vmem:[#allocation3] sm:$0xff] %vm483_vm1, %v444_v11 }
  0xe9   : > { %v1593_v12 = vpop.f32.mrb[2].mxu0 }
  0xea   : > { %487 = vst.msk [vmem:[#allocation3 + $0x18] sm:$0xff] %vm483_vm1, %v1593_v12  ;;  %v454_v13 = vpop.f32.mrb[3].mxu0 }
  0xeb   : > { %486 = vst.msk [vmem:[#allocation3 + $0x10] sm:$0xff] %vm483_vm1, %v454_v13 }
  0xed   : > { %v1596_v14 = vpop.f32.mrb[4].mxu0  ;;  %v507_v15 = vld [vmem:[#allocation3 + $0x8] sm:$0xff] }
  0xee   : > { %489 = vst.msk [vmem:[#allocation3 + $0x28] sm:$0xff] %vm483_vm1, %v1596_v14  ;;  %v464_v16 = vpop.f32.mrb[5].mxu0  ;;  %v505_v17 = vld [vmem:[#allocation3] sm:$0xff]  ;;  %v508_v18 = vmul.f32 0.93333334, %v507_v15 }
  0xef   : > { %v497_v19 = vmul.f32 0.46666667, %v507_v15  ;;  %488 = vst.msk [vmem:[#allocation3 + $0x20] sm:$0xff] %vm483_vm1, %v464_v16  ;;  %v506_v21 = vmul.f32 0.06666667, %v505_v17  ;;  %493 = vst.msk [vmem:[#allocation2 + $0x90] sm:$0xff] %vm483_vm1, %v505_v17 }
  0xf0   : > { %v495_v22 = vmul.f32 0.53333336, %v505_v17  ;;  %v517_v28 = vmul.f32 0.6, %v507_v15  ;;  %v528_v36 = vmul.f32 0.13333334, %v507_v15 }
  0xf1   : > { %v1599_v23 = vpop.f32.mrb[6].mxu0  ;;  %v509_v24 = vadd.f32 %v508_v18, %v506_v21  ;;  %v1794_v30 = vld [vmem:[#allocation3 + $0x18] sm:$0xff]  ;;  %v654_v18 = vlaneseq }
  0xf2   : > { %v498_v25 = vadd.f32 %v497_v19, %v495_v22  ;;  %491 = vst.msk [vmem:[#allocation3 + $0x38] sm:$0xff] %vm483_vm1, %v1599_v23  ;;  %v474_v26 = vpop.f32.mrb[7].mxu0  ;;  %v518_v27 = vld [vmem:[#allocation3 + $0x10] sm:$0xff]  ;;  %v541_v38 = vmul.f32 0.33333334, %v1794_v30 }
  0xf3   : > { %490 = vst.msk [vmem:[#allocation3 + $0x30] sm:$0xff] %vm483_vm1, %v474_v26  ;;  %511 = vrot.lane.b32.xlu1 %v509_v24, %s1685_s17  ;;  %v519_v29 = vmul.f32 0.4, %v518_v27  ;;  %v530_v32 = vmul.f32 0.8666667, %v518_v27  ;;  %v662_v22 = vshrl.u32 %v654_v18, 7 }
  0xf4   : > { %500 = vrot.lane.b32.xlu0 %v498_v25, %s1686_s18  ;;  %v539_v39 = vmul.f32 0.6666667, %v518_v27  ;;  %v572_v40 = vmul.f32 0.26666668, %v1794_v30  ;;  %v550_v55 = vmul.f32 0.2, %v518_v27 }
  0xf5   : > { %v520_v31 = vadd.f32 %v519_v29, %v517_v28  ;;  %v589_v33 = vld [vmem:[#allocation3 + $0x28] sm:$0xff]  ;;  %v531_v42 = vadd.f32 %v530_v32, %v528_v36  ;;  %v552_v56 = vmul.f32 0.8, %v1794_v30  ;;  %v561_v4 = vmul.f32 0.73333335, %v1794_v30 }
  0xf6   : > { %v587_v34 = vld [vmem:[#allocation3 + $0x20] sm:$0xff]  ;;  %v590_v35 = vmul.f32 0.6666667, %v589_v33  ;;  %v598_v46 = vmul.f32 0.8666667, %v589_v33  ;;  %v542_v48 = vadd.f32 %v541_v38, %v539_v39  ;;  %v1842_v25 = vand.u32 127, %v654_v18 }
  0xf7   : > { %v588_v37 = vmul.f32 0.33333334, %v587_v34  ;;  %v574_v41 = vmul.f32 0.73333335, %v587_v34  ;;  %v578_v50 = vmul.f32 0.8, %v587_v34  ;;  %v553_v62 = vadd.f32 %v552_v56, %v550_v55 }
  0xf8   : > { %522 = vrot.lane.b32.xlu0 %v520_v31, %s1687_s19  ;;  %v580_v51 = vmul.f32 0.2, %v589_v33  ;;  %v608_v54 = vmul.f32 0.4, %v589_v33  ;;  %v563_v0 = vmul.f32 0.26666668, %v587_v34 }
  0xf9   : > { %v591_v43 = vadd.f32 %v590_v35, %v588_v37  ;;  %v575_v45 = vadd.f32 %v574_v41, %v572_v40  ;;  %v619_v53 = vld [vmem:[#allocation3 + $0x38] sm:$0xff]  ;;  %v1844_v26 = vsub.s32 0, %v662_v22  ;;  %v1846_v27 = vsub.s32 1, %v662_v22  ;;  %v659_v28 = vld [vmem:[%s2164_s3] ss:$8 sm:$0x3] }
  0xfa   : > { %v599_v44 = vld [vmem:[#allocation3 + $0x30] sm:$0xff]  ;;  %v581_v57 = vadd.f32 %v580_v51, %v578_v50  ;;  %v620_v60 = vmul.f32 0.06666667, %v619_v53  ;;  %v630_v3 = vmul.f32 0.53333336, %v619_v53  ;;  %v564_v5 = vadd.f32 %v563_v0, %v561_v4 }
  0xfb   : > { %593 = vrot.lane.b32.xlu1 %v591_v43, %s1685_s17  ;;  %v600_v47 = vmul.f32 0.13333334, %v599_v44  ;;  %576 = vst.msk [vmem:[#allocation2 + $0x98] sm:$0xff] %vm483_vm1, %v575_v45  ;;  %v610_v52 = vmul.f32 0.6, %v599_v44  ;;  %v638_v7 = vmul.f32 0.0, %v599_v44  ;;  %v664_v31 = vrot.slane %v659_v28, %v1844_v26 }
  0xfc   : > { %533 = vrot.lane.b32.xlu0 %v531_v42, %s1688_s20  ;;  %v618_v59 = vmul.f32 0.93333334, %v599_v44  ;;  %v628_v1 = vmul.f32 0.46666667, %v599_v44  ;;  %vm656_vm9 = vcmp.lt.s32.totalorder %v1842_v25, 17  ;;  %v668_v32 = vrot.slane %v659_v28, %v1846_v27 }
  0xfd   : > { %v601_v49 = vadd.f32 %v600_v47, %v598_v46  ;;  %v611_v58 = vadd.f32 %v610_v52, %v608_v54  ;;  %v640_v8 = vadd.f32 %v638_v7, %v619_v53  ;;  %v1548_v33 = vld [vmem:[%s2164_s3 + $0x1] ss:$8 sm:$0x3]  ;;  %vm679_vm10 = vcmp.lt.s32.totalorder %v1842_v25, 16 }
  0xfe   : > { %v621_v63 = vadd.f32 %v620_v60, %v618_v59  ;;  %v631_v6 = vadd.f32 %v630_v3, %v628_v1  ;;  %v688_v41 = vrot.slane %v1548_v33, %v1844_v26  ;;  %v692_v42 = vrot.slane %v1548_v33, %v1846_v27  ;;  %v1549_v43 = vld [vmem:[%s2164_s3 + $0x2] ss:$8 sm:$0x3]  ;;  %v1550_v53 = vld [vmem:[%s2164_s3 + $0x3] ss:$8 sm:$0x3] }
  0xff   : > { %603 = vrot.lane.b32.xlu1 %v601_v49, %s1687_s19  ;;  %vm703_vm11 = vcmp.lt.s32.totalorder %v1842_v25, 15  ;;  %v712_v51 = vrot.slane %v1549_v43, %v1844_v26  ;;  %v716_v52 = vrot.slane %v1549_v43, %v1846_v27  ;;  %vm727_vm12 = vcmp.lt.s32.totalorder %v1842_v25, 1  ;;  %v1024_v33 = vld [vmem:[%s2165_s4 + $0x8] sm:$0xff] }
 0x100   : > { %544 = vrot.lane.b32.xlu0 %v542_v48, %s1689_s21  ;;  %v736_v60 = vrot.slane %v1550_v53, %v1844_v26  ;;  %v740_v61 = vrot.slane %v1550_v53, %v1846_v27  ;;  %vm753_vm13 = vcmp.lt.s32.totalorder %v1842_v25, 127  ;;  %vm777_vm14 = vcmp.lt.s32.totalorder %v1842_v25, 113  ;;  %1562 = vmatprep.mubr.msk.f32.mxu1 %vm483_vm1, %v1024_v33 }
 0x101   : > { %vm801_vm15 = vcmp.lt.s32.totalorder %v1842_v25, 112  ;;  %vm825_vm0 = vcmp.lt.s32.totalorder %v1842_v25, 111  ;;  %v1343_v25 = vld [vmem:[%s2167_s6] sm:$0xff] }
 0x103   : > { %613 = vrot.lane.b32.xlu1 %v611_v58, %s1688_s20 }
 0x104   : > { %583 = vrot.lane.b32.xlu0 %v581_v57, %s1686_s18 }
 0x107   : > { %623 = vrot.lane.b32.xlu1 %v621_v63, %s1689_s21 }
 0x108   : > { %555 = vrot.lane.b32.xlu0 %v553_v62, %s1691_s22  ;;  %v1551_v62 = vld [vmem:[%s2164_s3 + $0x5] ss:$8 sm:$0x3] }
 0x109   : > { %v766_v7 = vrot.slane %v1551_v62, %v1846_v27 }
 0x10b   : > { %633 = vrot.lane.b32.xlu1 %v631_v6, %s1691_s22  ;;  %v762_v6 = vrot.slane %v1551_v62, %v1844_v26 }
 0x10c   : > { %566 = vrot.lane.b32.xlu0 %v564_v5, %s1692_s23 }
 0x10f   : > { %642 = vrot.lane.b32.xlu1 %v640_v8, %s1692_s23  ;;  %v1552_v8 = vld [vmem:[%s2164_s3 + $0x6] ss:$8 sm:$0x3] }
 0x110   : > { %650 = vrot.lane.b32.xlu0 %v1768_v2, %s1693_s24 }
 0x113   : > { %652 = vrot.lane.b32.xlu1 %v1786_v20, %s1693_s24 }
 0x114   : > { %675 = vrot.lane.b32.xlu0 %v1768_v2, %s1686_s18 }
 0x117   : > { %677 = vrot.lane.b32.xlu1 %v1786_v20, %s1686_s18 }
 0x118   : > { %699 = vrot.lane.b32.xlu0 %v1768_v2, %s1694_s25 }
 0x11b   : > { %701 = vrot.lane.b32.xlu1 %v1786_v20, %s1694_s25 }
 0x11c   : > { %723 = vrot.lane.b32.xlu0 %v1768_v2, %s1695_s26 }
 0x11f   : > { %725 = vrot.lane.b32.xlu1 %v1786_v20, %s1695_s26 }
 0x120   : > { %749 = vrot.lane.b32.xlu0 %v1768_v2, %s1696_s29 }
 0x123   : > { %751 = vrot.lane.b32.xlu1 %v1786_v20, %s1696_s29 }
 0x124   : > { %773 = vrot.lane.b32.xlu0 %v1768_v2, %s1697_s30 }
 0x127   : > { %775 = vrot.lane.b32.xlu1 %v1786_v20, %s1697_s30 }
 0x128   : > { %797 = vrot.lane.b32.xlu0 %v1768_v2, %s1692_s23 }
 0x12b   : > { %799 = vrot.lane.b32.xlu1 %v1786_v20, %s1692_s23 }
 0x165   : > { %v512_v9 = vpop.permute.xlu1 %511 }
 0x166   : > { %v501_v10 = vpop.permute.xlu0 %500 }
 0x167   : > { %504 = vst.msk [vmem:[#allocation2 + $0x90] sm:$0xff] %vm503_vm2, %v501_v10 }
 0x168   : > { %515 = vst.msk [vmem:[#allocation2 + $0x90] sm:$0xff] %vm514_vm3, %v512_v9 }
 0x16a   : > { %v523_v11 = vpop.permute.xlu0 %522 }
 0x16b   : > { %526 = vst.msk [vmem:[#allocation2 + $0x90] sm:$0xff] %vm525_vm4, %v523_v11 }
 0x16d   : > { %v594_v13 = vpop.permute.xlu1 %593 }
 0x16e   : > { %v534_v12 = vpop.permute.xlu0 %533 }
 0x16f   : > { %537 = vst.msk [vmem:[#allocation2 + $0x90] sm:$0xff] %vm536_vm5, %v534_v12 }
 0x171   : > { %v604_v15 = vpop.permute.xlu1 %603 }
 0x172   : > { %v545_v14 = vpop.permute.xlu0 %544 }
 0x173   : > { %548 = vst.msk [vmem:[#allocation2 + $0x90] sm:$0xff] %vm547_vm6, %v545_v14 }
 0x175   : > { %v614_v17 = vpop.permute.xlu1 %613 }
 0x176   : > { %v584_v16 = vpop.permute.xlu0 %583 }
 0x177   : > { %586 = vst.msk [vmem:[#allocation2 + $0x98] sm:$0xff] %vm503_vm2, %v584_v16  ;;  %v790_v16 = vrot.slane %v1552_v8, %v1846_v27 }
 0x178   : > { %596 = vst.msk [vmem:[#allocation2 + $0x98] sm:$0xff] %vm514_vm3, %v594_v13 }
 0x179   : > { %606 = vst.msk [vmem:[#allocation2 + $0x98] sm:$0xff] %vm525_vm4, %v604_v15  ;;  %v624_v21 = vpop.permute.xlu1 %623  ;;  %v786_v15 = vrot.slane %v1552_v8, %v1844_v26 }
 0x17a   : > { %616 = vst.msk [vmem:[#allocation2 + $0x98] sm:$0xff] %vm536_vm5, %v614_v17  ;;  %v556_v19 = vpop.permute.xlu0 %555 }
 0x17b   : > { %559 = vst.msk [vmem:[#allocation2 + $0x90] sm:$0xff] %vm558_vm7, %v556_v19 }
 0x17c   : > { %626 = vst.msk [vmem:[#allocation2 + $0x98] sm:$0xff] %vm547_vm6, %v624_v21 }
 0x17d   : > { %v634_v24 = vpop.permute.xlu1 %633 }
 0x17e   : > { %v567_v23 = vpop.permute.xlu0 %566  ;;  %636 = vst.msk [vmem:[#allocation2 + $0x98] sm:$0xff] %vm558_vm7, %v634_v24 }
 0x17f   : > { %570 = vst.msk [vmem:[#allocation2 + $0x90] sm:$0xff] %vm569_vm8, %v567_v23 }
 0x181   : > { %v643_v29 = vpop.permute.xlu1 %642 }
 0x182   : > { %v651_v30 = vpop.permute.xlu0 %650  ;;  %645 = vst.msk [vmem:[#allocation2 + $0x98] sm:$0xff] %vm569_vm8, %v643_v29 }
 0x185   : > { %v653_v36 = vpop.permute.xlu1 %652 }
 0x186   : > { %v1857_v34 = vld [vmem:[#allocation2 + $0x90] sm:$0xff]  ;;  %v676_v35 = vpop.permute.xlu0 %675  ;;  %v657_v37 = vsel %vm656_vm9, %v651_v30, %v653_v36  ;;  %v658_v38 = vsel %vm656_vm9, %v653_v36, %v651_v30  ;;  %v1146_v36 = vld [vmem:[%s2166_s5] sm:$0xf] }
 0x187   : > { %847 = vrot.lane.b32.xlu0 %v1857_v34, %s1693_s24  ;;  %v671_v39 = vmul.f32 %v664_v31, %v658_v38  ;;  %v672_v40 = vmul.f32 %v668_v32, %v657_v37  ;;  %v853_v37 = vld [vmem:[%s2164_s3] ss:$8 sm:$0x3] }
 0x189   : > { %v1871_v44 = vld [vmem:[#allocation2 + $0x98] sm:$0xff]  ;;  %673 = vst [vmem:[#allocation2] sm:$0xf] %v671_v39  ;;  %674 = vst [vmem:[#allocation2 + $0x8] sm:$0xf] %v672_v40  ;;  %v678_v46 = vpop.permute.xlu1 %677  ;;  %v858_v39 = vrot.slane %v853_v37, %v1844_v26  ;;  %v862_v40 = vrot.slane %v853_v37, %v1846_v27 }
 0x18a   : > { %v700_v45 = vpop.permute.xlu0 %699  ;;  %849 = vrot.lane.b32.xlu1 %v1871_v44, %s1693_s24  ;;  %v680_v47 = vsel %vm679_vm10, %v676_v35, %v678_v46  ;;  %v681_v48 = vsel %vm679_vm10, %v678_v46, %v676_v35  ;;  %v1699_v35 = vmov 0  }
 0x18b   : > { %869 = vrot.lane.b32.xlu0 %v1857_v34, %s1686_s18  ;;  %v695_v49 = vmul.f32 %v688_v41, %v681_v48  ;;  %v696_v50 = vmul.f32 %v692_v42, %v680_v47  ;;  %v1555_v41 = vld [vmem:[%s2164_s3 + $0x1] ss:$8 sm:$0x3] }
 0x18c   : > { %1675 = vset.pattern.permute.xlu0 %v1699_v35 }
 0x18d   : > { %697 = vst [vmem:[#allocation2 + $0x20] sm:$0xf] %v695_v49  ;;  %698 = vst [vmem:[#allocation2 + $0x28] sm:$0xf] %v696_v50  ;;  %v702_v55 = vpop.permute.xlu1 %701  ;;  %v880_v49 = vrot.slane %v1555_v41, %v1844_v26  ;;  %v884_v50 = vrot.slane %v1555_v41, %v1846_v27 }
 0x18e   : > { %v724_v54 = vpop.permute.xlu0 %723  ;;  %871 = vrot.lane.b32.xlu1 %v1871_v44, %s1686_s18  ;;  %v704_v56 = vsel %vm703_vm11, %v700_v45, %v702_v55  ;;  %v705_v57 = vsel %vm703_vm11, %v702_v55, %v700_v45 }
 0x18f   : > { %891 = vrot.lane.b32.xlu0 %v1857_v34, %s1694_s25  ;;  %v719_v58 = vmul.f32 %v712_v51, %v705_v57  ;;  %v720_v59 = vmul.f32 %v716_v52, %v704_v56  ;;  %v1556_v51 = vld [vmem:[%s2164_s3 + $0x2] ss:$8 sm:$0x3] }
 0x190   : > { %v1028_v52 = vld [vmem:[#allocation2 + $0x8] sm:$0xff]  ;;  %v1027_v53 = vld [vmem:[#allocation2] sm:$0xff]  ;;  %v902_v62 = vrot.slane %v1556_v51, %v1844_v26 }
 0x191   : > { %721 = vst [vmem:[#allocation2 + $0x40] sm:$0xf] %v719_v58  ;;  %722 = vst [vmem:[#allocation2 + $0x48] sm:$0xf] %v720_v59  ;;  %v726_v0 = vpop.permute.xlu1 %725 }
 0x192   : > { %v750_v63 = vpop.permute.xlu0 %749  ;;  %893 = vrot.lane.b32.xlu1 %v1871_v44, %s1694_s25  ;;  %v728_v1 = vsel %vm727_vm12, %v724_v54, %v726_v0  ;;  %v729_v3 = vsel %vm727_vm12, %v726_v0, %v724_v54  ;;  %v1557_v0 = vld [vmem:[%s2164_s3 + $0x3] ss:$8 sm:$0x3] }
 0x193   : > { %913 = vrot.lane.b32.xlu0 %v1857_v34, %s1695_s26  ;;  %v743_v4 = vmul.f32 %v736_v60, %v729_v3  ;;  %v744_v5 = vmul.f32 %v740_v61, %v728_v1 }
 0x194   : > { %v1032_v1 = vld [vmem:[#allocation2 + $0x28] sm:$0xff]  ;;  %v1031_v3 = vld [vmem:[#allocation2 + $0x20] sm:$0xff] }
 0x195   : > { %745 = vst [vmem:[#allocation2 + $0x60] sm:$0xf] %v743_v4  ;;  %746 = vst [vmem:[#allocation2 + $0x68] sm:$0xf] %v744_v5  ;;  %v752_v9 = vpop.permute.xlu1 %751 }
 0x196   : > { %915 = vrot.lane.b32.xlu1 %v1871_v44, %s1695_s26  ;;  %v754_v10 = vsel %vm753_vm13, %v750_v63, %v752_v9  ;;  %v755_v11 = vsel %vm753_vm13, %v752_v9, %v750_v63  ;;  %v774_v12 = vpop.permute.xlu0 %773  ;;  %v906_v63 = vrot.slane %v1556_v51, %v1846_v27 }
 0x197   : > { %821 = vrot.lane.b32.xlu0 %v1768_v2, %s1698_s10  ;;  %v769_v13 = vmul.f32 %v762_v6, %v754_v10  ;;  %v770_v14 = vmul.f32 %v766_v7, %v755_v11  ;;  %v1553_v2 = vld [vmem:[%s2164_s3 + $0x7] ss:$8 sm:$0x3] }
 0x198   : > { %v810_v23 = vrot.slane %v1553_v2, %v1844_v26  ;;  %v814_v24 = vrot.slane %v1553_v2, %v1846_v27 }
 0x199   : > { %771 = vst [vmem:[#allocation2 + $0xa0] sm:$0xf] %v769_v13  ;;  %772 = vst [vmem:[#allocation2 + $0xa8] sm:$0xf] %v770_v14  ;;  %v776_v17 = vpop.permute.xlu1 %775  ;;  %v928_v13 = vrot.slane %v1557_v0, %v1846_v27 }
 0x19a   : > { %823 = vrot.lane.b32.xlu1 %v1786_v20, %s1698_s10  ;;  %v778_v18 = vsel %vm777_vm14, %v774_v12, %v776_v17  ;;  %v779_v19 = vsel %vm777_vm14, %v776_v17, %v774_v12  ;;  %v798_v28 = vpop.permute.xlu0 %797  ;;  %v924_v12 = vrot.slane %v1557_v0, %v1844_v26  ;;  %v1554_v14 = vld [vmem:[%s2164_s3 + $0x10] ss:$8 sm:$0x3] }
 0x19b   : > { %935 = vrot.lane.b32.xlu0 %v1857_v34, %s1696_s29  ;;  %v793_v21 = vmul.f32 %v786_v15, %v778_v18  ;;  %v794_v22 = vmul.f32 %v790_v16, %v779_v19  ;;  %v1036_v15 = vld [vmem:[#allocation2 + $0x48] sm:$0xff]  ;;  %v1035_v16 = vld [vmem:[#allocation2 + $0x40] sm:$0xff] }
 0x19d   : > { %795 = vst [vmem:[#allocation2 + $0xc0] sm:$0xf] %v793_v21  ;;  %796 = vst [vmem:[#allocation2 + $0xc8] sm:$0xf] %v794_v22  ;;  %v800_v29 = vpop.permute.xlu1 %799 }
 0x19e   : > { %937 = vrot.lane.b32.xlu1 %v1871_v44, %s1696_s29  ;;  %v802_v20 = vsel %vm801_vm15, %v798_v28, %v800_v29  ;;  %v803_v30 = vsel %vm801_vm15, %v800_v29, %v798_v28  ;;  %v834_v28 = vrot.slane %v1554_v14, %v1844_v26  ;;  %v838_v29 = vrot.slane %v1554_v14, %v1846_v27 }
 0x19f   : > { %957 = vrot.lane.b32.xlu0 %v1857_v34, %s1697_s30  ;;  %v817_v31 = vmul.f32 %v810_v23, %v802_v20  ;;  %v818_v32 = vmul.f32 %v814_v24, %v803_v30  ;;  %v1044_v20 = vld [vmem:[#allocation2 + $0x88] sm:$0xff] }
 0x1a0   : > { %v1558_v30 = vld [vmem:[%s2164_s3 + $0x5] ss:$8 sm:$0x3] }
 0x1a1   : > { %819 = vst [vmem:[#allocation2 + $0xe0] sm:$0xf] %v817_v31  ;;  %820 = vst [vmem:[#allocation2 + $0xe8] sm:$0xf] %v818_v32  ;;  %v1040_v31 = vld [vmem:[#allocation2 + $0x68] sm:$0xff]  ;;  %v1039_v32 = vld [vmem:[#allocation2 + $0x60] sm:$0xff] }
 0x1a2   : > { %959 = vrot.lane.b32.xlu1 %v1871_v44, %s1697_s30 }
 0x1a3   : > { %979 = vrot.lane.b32.xlu0 %v1857_v34, %s1692_s23 }
 0x1a6   : > { %981 = vrot.lane.b32.xlu1 %v1871_v44, %s1692_s23 }
 0x1a7   : > { %1001 = vrot.lane.b32.xlu0 %v1857_v34, %s1698_s10 }
 0x1aa   : > { %1003 = vrot.lane.b32.xlu1 %v1871_v44, %s1698_s10 }
 0x1ab   : > { %1149 = vperm.xlu0 %1675, %v1146_v36  }
 0x1f9   : > { %v848_v38 = vpop.permute.xlu0 %847 }
 0x1fc   : > { %v850_v43 = vpop.permute.xlu1 %849 }
 0x1fd   : > { %v870_v42 = vpop.permute.xlu0 %869  ;;  %v851_v45 = vsel %vm656_vm9, %v848_v38, %v850_v43  ;;  %v852_v46 = vsel %vm656_vm9, %v850_v43, %v848_v38  ;;  %v946_v43 = vrot.slane %v1558_v30, %v1844_v26 }
 0x1fe   : > { %v865_v47 = vmul.f32 %v858_v39, %v852_v46  ;;  %v866_v48 = vmul.f32 %v862_v40, %v851_v45  ;;  %v1616_v40 = vpack.c.bf16 %v1871_v44, %v1044_v20  ;;  %v950_v45 = vrot.slane %v1558_v30, %v1846_v27  ;;  %v1043_v46 = vld [vmem:[#allocation2 + $0x80] sm:$0xff] }
 0x1ff   : > { %v1618_v51 = vpack.c.bf16 %v1857_v34, %v1043_v46  ;;  %v1025_v46 = vld [vmem:[%s2165_s4 + $0x10] sm:$0xff] }
 0x200   : > { %867 = vst [vmem:[#allocation2 + $0x10] sm:$0xff] %v865_v47  ;;  %868 = vst [vmem:[#allocation2 + $0x18] sm:$0xff] %v866_v48  ;;  %v872_v55 = vpop.permute.xlu1 %871  ;;  %v1600_v56 = vpack.c.bf16 %v866_v48, %v1028_v52  ;;  %v1602_v57 = vpack.c.bf16 %v865_v47, %v1027_v53  ;;  %v1559_v47 = vld [vmem:[%s2164_s3 + $0x6] ss:$8 sm:$0x3] }
 0x201   : > { %v892_v54 = vpop.permute.xlu0 %891  ;;  %v873_v58 = vsel %vm679_vm10, %v870_v42, %v872_v55  ;;  %v874_v59 = vsel %vm679_vm10, %v872_v55, %v870_v42  ;;  %v972_v55 = vrot.slane %v1559_v47, %v1846_v27 }
 0x202   : > { %v887_v60 = vmul.f32 %v880_v49, %v874_v59  ;;  %v888_v61 = vmul.f32 %v884_v50, %v873_v58  ;;  %1601 = vmatprep.subr.bf16.mxu1 %v1600_v56  ;;  %v1560_v56 = vld [vmem:[%s2164_s3 + $0x7] ss:$8 sm:$0x3] }
 0x203   : > { %1603 = vmatpush1.bf16.msra.mxu1 %v1602_v57  ;;  %v1048_v57 = vld [vmem:[#allocation2 + $0xa8] sm:$0xff]  ;;  %v1047_v58 = vld [vmem:[#allocation2 + $0xa0] sm:$0xff] }
 0x204   : > { %889 = vst [vmem:[#allocation2 + $0x30] sm:$0xff] %v887_v60  ;;  %890 = vst [vmem:[#allocation2 + $0x38] sm:$0xff] %v888_v61  ;;  %v894_v5 = vpop.permute.xlu1 %893  ;;  %v1604_v6 = vpack.c.bf16 %v888_v61, %v1032_v1  ;;  %v1606_v7 = vpack.c.bf16 %v887_v60, %v1031_v3  ;;  %v990_v3 = vrot.slane %v1560_v56, %v1844_v26 }
 0x205   : > { %v914_v4 = vpop.permute.xlu0 %913  ;;  %v895_v8 = vsel %vm703_vm11, %v892_v54, %v894_v5  ;;  %v896_v9 = vsel %vm703_vm11, %v894_v5, %v892_v54  ;;  %v968_v54 = vrot.slane %v1559_v47, %v1844_v26  ;;  %v1561_v5 = vld [vmem:[%s2164_s3 + $0x10] ss:$8 sm:$0x3]  ;;  %v1437_v47 = vld [vmem:[%s2168_s7] sm:$0xf] }
 0x206   : > { %v909_v10 = vmul.f32 %v902_v62, %v896_v9  ;;  %v910_v11 = vmul.f32 %v906_v63, %v895_v8  ;;  %1605 = vmatprep.subr.bf16.mxu1 %v1604_v6  ;;  %v1052_v6 = vld [vmem:[#allocation2 + $0xc8] sm:$0xff] }
 0x207   : > { %1607 = vmatpush1.bf16.msra.mxu1 %v1606_v7  ;;  %v1051_v7 = vld [vmem:[#allocation2 + $0xc0] sm:$0xff] }
 0x208   : > { %911 = vst [vmem:[#allocation2 + $0x50] sm:$0xff] %v909_v10  ;;  %912 = vst [vmem:[#allocation2 + $0x58] sm:$0xff] %v910_v11  ;;  %v916_v17 = vpop.permute.xlu1 %915  ;;  %v1608_v18 = vpack.c.bf16 %v910_v11, %v1036_v15  ;;  %v1610_v19 = vpack.c.bf16 %v909_v10, %v1035_v16  ;;  %v1012_v15 = vrot.slane %v1561_v5, %v1844_v26 }
 0x209   : > { %v822_v2 = vpop.permute.xlu0 %821  ;;  %v917_v21 = vsel %vm727_vm12, %v914_v4, %v916_v17  ;;  %v918_v22 = vsel %vm727_vm12, %v916_v17, %v914_v4  ;;  %v994_v4 = vrot.slane %v1560_v56, %v1846_v27  ;;  %v1016_v16 = vrot.slane %v1561_v5, %v1846_v27  ;;  %v1055_v17 = vld [vmem:[#allocation2 + $0xe0] sm:$0xff] }
 0x20a   : > { %v931_v23 = vmul.f32 %v924_v12, %v918_v22  ;;  %v932_v24 = vmul.f32 %v928_v13, %v917_v21  ;;  %1609 = vmatprep.subr.bf16.mxu1 %v1608_v18 }
 0x20b   : > { %1611 = vmatpush1.bf16.msra.mxu1 %v1610_v19 }
 0x20c   : > { %933 = vst [vmem:[#allocation2 + $0x70] sm:$0xff] %v931_v23  ;;  %934 = vst [vmem:[#allocation2 + $0x78] sm:$0xff] %v932_v24  ;;  %v824_v35 = vpop.permute.xlu1 %823  ;;  %v1612_v36 = vpack.c.bf16 %v932_v24, %v1040_v31  ;;  %v1614_v37 = vpack.c.bf16 %v931_v23, %v1039_v32 }
 0x20d   : > { %v936_v33 = vpop.permute.xlu0 %935  ;;  %v826_v38 = vsel %vm825_vm0, %v822_v2, %v824_v35  ;;  %v827_v39 = vsel %vm825_vm0, %v824_v35, %v822_v2  ;;  %v1056_v2 = vld [vmem:[#allocation2 + $0xe8] sm:$0xff] }
 0x20e   : > { %v841_v41 = vmul.f32 %v834_v28, %v826_v38  ;;  %v842_v42 = vmul.f32 %v838_v29, %v827_v39  ;;  %1613 = vmatprep.subr.bf16.mxu1 %v1612_v36 }
 0x20f   : > { %1615 = vmatpush1.bf16.msra.mxu1 %v1614_v37 }
 0x210   : > { %843 = vst [vmem:[#allocation2 + $0x100] sm:$0xf] %v841_v41  ;;  %844 = vst [vmem:[#allocation2 + $0x108] sm:$0xf] %v842_v42  ;;  %v938_v49 = vpop.permute.xlu1 %937  ;;  %1617 = vmatprep.subr.bf16.mxu1 %v1616_v40 }
 0x211   : > { %v958_v48 = vpop.permute.xlu0 %957  ;;  %v939_v44 = vsel %vm753_vm13, %v936_v33, %v938_v49  ;;  %v940_v50 = vsel %vm753_vm13, %v938_v49, %v936_v33  ;;  %v1023_v33 = vld [vmem:[%s2165_s4] sm:$0xff] }
 0x212   : > { %v953_v52 = vmul.f32 %v946_v43, %v939_v44  ;;  %v954_v53 = vmul.f32 %v950_v45, %v940_v50  ;;  %v1026_v45 = vld [vmem:[%s2165_s4 + $0x18] sm:$0xff] }
 0x213   : > { %1619 = vmatpush1.bf16.msra.mxu1 %v1618_v51 }
 0x214   : > { %v960_v59 = vpop.permute.xlu1 %959  ;;  %v1620_v60 = vpack.c.bf16 %v954_v53, %v1048_v57  ;;  %v1622_v61 = vpack.c.bf16 %v953_v52, %v1047_v58  ;;  %v1564_v52 = vld [vmem:[%s2164_s3 + $0x1] ss:$8 sm:$0x3] }
 0x215   : > { %v961_v62 = vsel %vm777_vm14, %v958_v48, %v960_v59  ;;  %v962_v34 = vsel %vm777_vm14, %v960_v59, %v958_v48  ;;  %v980_v63 = vpop.permute.xlu0 %979  ;;  %v1171_v48 = vld [vmem:[%s2164_s3] ss:$8 sm:$0x3]  ;;  %v1198_v59 = vrot.slane %v1564_v52, %v1844_v26 }
 0x216   : > { %v975_v0 = vmul.f32 %v968_v54, %v961_v62  ;;  %v976_v1 = vmul.f32 %v972_v55, %v962_v34  ;;  %1621 = vmatprep.subr.bf16.mxu1 %v1620_v60  ;;  %v1176_v50 = vrot.slane %v1171_v48, %v1844_v26  ;;  %v1180_v51 = vrot.slane %v1171_v48, %v1846_v27 }
 0x217   : > { %1623 = vmatpush1.bf16.msra.mxu1 %v1622_v61  ;;  %v1060_v20 = vld [vmem:[#allocation2 + $0x108] sm:$0xff]  ;;  %v1059_v30 = vld [vmem:[#allocation2 + $0x100] sm:$0xff]  ;;  %v1202_v60 = vrot.slane %v1564_v52, %v1846_v27 }
 0x218   : > { %v982_v8 = vpop.permute.xlu1 %981  ;;  %v1624_v9 = vpack.c.bf16 %v976_v1, %v1052_v6  ;;  %v1626_v10 = vpack.c.bf16 %v975_v0, %v1051_v7  ;;  %v1565_v61 = vld [vmem:[%s2164_s3 + $0x2] ss:$8 sm:$0x3]  ;;  %v1566_v6 = vld [vmem:[%s2164_s3 + $0x3] ss:$8 sm:$0x3] }
 0x219   : > { %v983_v11 = vsel %vm801_vm15, %v980_v63, %v982_v8  ;;  %v984_v12 = vsel %vm801_vm15, %v982_v8, %v980_v63  ;;  %v1002_v18 = vpop.permute.xlu0 %1001  ;;  %v1224_v5 = vrot.slane %v1565_v61, %v1846_v27 }
 0x21a   : > { %v997_v13 = vmul.f32 %v990_v3, %v983_v11  ;;  %v998_v14 = vmul.f32 %v994_v4, %v984_v12  ;;  %1625 = vmatprep.subr.bf16.mxu1 %v1624_v9  ;;  %v1220_v4 = vrot.slane %v1565_v61, %v1844_v26 }
 0x21b   : > { %1627 = vmatpush1.bf16.msra.mxu1 %v1626_v10 }
 0x21c   : > { %v1004_v19 = vpop.permute.xlu1 %1003  ;;  %v1628_v21 = vpack.c.bf16 %v998_v14, %v1056_v2  ;;  %v1630_v22 = vpack.c.bf16 %v997_v13, %v1055_v17  ;;  %v1242_v13 = vrot.slane %v1566_v6, %v1844_v26  ;;  %v1246_v14 = vrot.slane %v1566_v6, %v1846_v27 }
 0x21d   : > { %v1005_v23 = vsel %vm825_vm0, %v1002_v18, %v1004_v19  ;;  %v1006_v24 = vsel %vm825_vm0, %v1004_v19, %v1002_v18 }
 0x21e   : > { %v1019_v28 = vmul.f32 %v1012_v15, %v1005_v23  ;;  %v1020_v29 = vmul.f32 %v1016_v16, %v1006_v24  ;;  %1629 = vmatprep.subr.bf16.mxu1 %v1628_v21  ;;  %v1567_v15 = vld [vmem:[%s2164_s3 + $0x5] ss:$8 sm:$0x3]  ;;  %v1568_v24 = vld [vmem:[%s2164_s3 + $0x6] ss:$8 sm:$0x3] }
 0x21f   : > { %1631 = vmatpush1.bf16.msra.mxu1 %v1630_v22  ;;  %v1266_v21 = vrot.slane %v1567_v15, %v1844_v26  ;;  %v1270_v22 = vrot.slane %v1567_v15, %v1846_v27 }
 0x220   : > { %v1632_v31 = vpack.c.bf16 %v1020_v29, %v1060_v20  ;;  %v1634_v32 = vpack.c.bf16 %v1019_v28, %v1059_v30 }
 0x222   : > { %1633 = vmatprep.subr.bf16.mxu1 %v1632_v31 }
 0x223   : > { %1635 = vmatpush1.bf16.msra.mxu1 %v1634_v32 }
 0x226   : > { %1134 = vmatmul.mubr.f32.vlgmr.msra.gmra.mrb[0].mxu1 %v1023_v33 }
 0x227   : > { %1563 = vmatprep.mubr.msk.f32.mxu1 %vm483_vm1, %v1026_v45  ;;  %vm1362_vm1 = vcmask 588800  }
 0x22a   : > { %v1150_v35 = vpop.permute.xlu0 %1149  ;;  %1140 = vmatmul.mubr.f32.gmra.mrb[2].mxu1 %v1025_v46 }
 0x2f9   : > { %v1135_v36 = vpop.f32.mrb[0].mxu1 }
 0x2fa   : > { %v1152_v37 = vadd.f32 %v1150_v35, %v1135_v36  ;;  %v1137_v38 = vpop.f32.mrb[1].mxu1 }
 0x2fb   : > { %v1153_v39 = vadd.f32 %v1150_v35, %v1137_v38 }
 0x2fc   : > { %vm1154_vm2 = vcmp.ge.f32.partialorder %v1152_v37, 0.0  ;;  %v1156_v40 = vmul.f32 0.2, %v1152_v37 }
 0x2fd   : > { %vm1155_vm3 = vcmp.ge.f32.partialorder %v1153_v39, 0.0  ;;  %v1157_v41 = vmul.f32 0.2, %v1153_v39 }
 0x2fe   : > { %v1158_v42 = vsel %vm1154_vm2, %v1152_v37, %v1156_v40  ;;  %v1292_v40 = vrot.slane %v1568_v24, %v1846_v27 }
 0x2ff   : > { %1253 = vst [vmem:[#allocation2 + $0x40] sm:$0xf] %v1158_v42  ;;  %v1159_v43 = vsel %vm1155_vm3, %v1153_v39, %v1157_v41  ;;  %1187 = vrot.lane.b32.xlu0 %v1158_v42, %s1686_s18  ;;  %1165 = vrot.lane.b32.xlu1 %v1158_v42, %s1693_s24  ;;  %v1288_v39 = vrot.slane %v1568_v24, %v1844_v26  ;;  %v1569_v41 = vld [vmem:[%s2164_s3 + $0x7] ss:$8 sm:$0x3] }
 0x300   : > { %1254 = vst [vmem:[#allocation2 + $0x48] sm:$0xf] %v1159_v43 }
 0x303   : > { %1209 = vrot.lane.b32.xlu0 %v1158_v42, %s1694_s25  ;;  %1167 = vrot.lane.b32.xlu1 %v1159_v43, %s1693_s24 }
 0x307   : > { %1231 = vrot.lane.b32.xlu0 %v1158_v42, %s1695_s26  ;;  %1189 = vrot.lane.b32.xlu1 %v1159_v43, %s1686_s18 }
 0x30b   : > { %1255 = vrot.lane.b32.xlu0 %v1158_v42, %s1696_s29  ;;  %1211 = vrot.lane.b32.xlu1 %v1159_v43, %s1694_s25 }
 0x30f   : > { %1277 = vrot.lane.b32.xlu0 %v1158_v42, %s1697_s30  ;;  %1233 = vrot.lane.b32.xlu1 %v1159_v43, %s1695_s26 }
 0x313   : > { %1299 = vrot.lane.b32.xlu0 %v1158_v42, %s1692_s23  ;;  %1257 = vrot.lane.b32.xlu1 %v1159_v43, %s1696_s29  ;;  %s325_s29 = scalar_lea.vmem %s2169_s8, %s1574_s9 }
 0x317   : > { %1321 = vrot.lane.b32.xlu0 %v1158_v42, %s1698_s10  ;;  %1279 = vrot.lane.b32.xlu1 %v1159_v43, %s1697_s30 }
 0x31b   : > { %1440 = vperm.xlu0 %1675, %v1437_v47   ;;  %1301 = vrot.lane.b32.xlu1 %v1159_v43, %s1692_s23 }
 0x31f   : > { %1323 = vrot.lane.b32.xlu1 %v1159_v43, %s1698_s10 }
 0x371   : > { %v1188_v49 = vpop.permute.xlu0 %1187  ;;  %v1166_v44 = vpop.permute.xlu1 %1165 }
 0x375   : > { %v1210_v53 = vpop.permute.xlu0 %1209  ;;  %v1168_v54 = vpop.permute.xlu1 %1167 }
 0x376   : > { %v1169_v55 = vsel %vm656_vm9, %v1166_v44, %v1168_v54  ;;  %v1170_v56 = vsel %vm656_vm9, %v1168_v54, %v1166_v44  ;;  %v1314_v44 = vrot.slane %v1569_v41, %v1846_v27 }
 0x377   : > { %v1183_v57 = vmul.f32 %v1176_v50, %v1170_v56  ;;  %v1184_v58 = vmul.f32 %v1180_v51, %v1169_v55  ;;  %v1570_v51 = vld [vmem:[%s2164_s3 + $0x10] ss:$8 sm:$0x3] }
 0x379   : > { %1185 = vst [vmem:[#allocation2] sm:$0xf] %v1183_v57  ;;  %1186 = vst [vmem:[#allocation2 + $0x8] sm:$0xf] %v1184_v58  ;;  %v1232_v62 = vpop.permute.xlu0 %1231  ;;  %v1190_v34 = vpop.permute.xlu1 %1189 }
 0x37a   : > { %v1191_v63 = vsel %vm679_vm10, %v1188_v49, %v1190_v34  ;;  %v1192_v0 = vsel %vm679_vm10, %v1190_v34, %v1188_v49  ;;  %v1310_v49 = vrot.slane %v1569_v41, %v1844_v26  ;;  %v1336_v34 = vrot.slane %v1570_v51, %v1846_v27 }
 0x37b   : > { %v1205_v1 = vmul.f32 %v1198_v59, %v1192_v0  ;;  %v1206_v3 = vmul.f32 %v1202_v60, %v1191_v63  ;;  %v1352_v63 = vld [vmem:[#allocation2 + $0x40] sm:$0xff]  ;;  %v1353_v0 = vld [vmem:[#allocation2 + $0x48] sm:$0xff] }
 0x37d   : > { %1207 = vst [vmem:[#allocation2 + $0x10] sm:$0xf] %v1205_v1  ;;  %1208 = vst [vmem:[#allocation2 + $0x18] sm:$0xf] %v1206_v3  ;;  %v1212_v7 = vpop.permute.xlu1 %1211  ;;  %v1256_v10 = vpop.permute.xlu0 %1255 }
 0x37e   : > { %v1213_v8 = vsel %vm703_vm11, %v1210_v53, %v1212_v7  ;;  %v1214_v9 = vsel %vm703_vm11, %v1212_v7, %v1210_v53 }
 0x37f   : > { %v1227_v11 = vmul.f32 %v1220_v4, %v1214_v9  ;;  %v1228_v12 = vmul.f32 %v1224_v5, %v1213_v8 }
 0x380   : > { %v1345_v23 = vld [vmem:[#allocation2 + $0x8] sm:$0xff]  ;;  %v1344_v29 = vld [vmem:[#allocation2] sm:$0xff] }
 0x381   : > { %1229 = vst [vmem:[#allocation2 + $0x20] sm:$0xf] %v1227_v11  ;;  %1230 = vst [vmem:[#allocation2 + $0x28] sm:$0xf] %v1228_v12  ;;  %v1234_v16 = vpop.permute.xlu1 %1233  ;;  %v1278_v30 = vpop.permute.xlu0 %1277 }
 0x382   : > { %v1235_v2 = vsel %vm727_vm12, %v1232_v62, %v1234_v16  ;;  %v1236_v17 = vsel %vm727_vm12, %v1234_v16, %v1232_v62  ;;  %v1332_v62 = vrot.slane %v1570_v51, %v1844_v26 }
 0x383   : > { %v1249_v18 = vmul.f32 %v1242_v13, %v1236_v17  ;;  %v1250_v19 = vmul.f32 %v1246_v14, %v1235_v2  ;;  %v1141_v17 = vpop.f32.mrb[2].mxu1 }
 0x384   : > { %v1347_v28 = vld [vmem:[#allocation2 + $0x18] sm:$0xff]  ;;  %v1346_v20 = vld [vmem:[#allocation2 + $0x10] sm:$0xff] }
 0x385   : > { %1251 = vst [vmem:[#allocation2 + $0x30] sm:$0xf] %v1249_v18  ;;  %1252 = vst [vmem:[#allocation2 + $0x38] sm:$0xf] %v1250_v19  ;;  %v1258_v31 = vpop.permute.xlu1 %1257  ;;  %v1636_v32 = vpack.c.bf16 %v1347_v28, %v1345_v23  ;;  %v1638_v33 = vpack.c.bf16 %v1346_v20, %v1344_v29  ;;  %v1300_v46 = vpop.permute.xlu0 %1299 }
 0x386   : > { %v1259_v35 = vsel %vm753_vm13, %v1256_v10, %v1258_v31  ;;  %v1260_v36 = vsel %vm753_vm13, %v1258_v31, %v1256_v10  ;;  %v1143_v18 = vpop.f32.mrb[3].mxu1 }
 0x387   : > { %v1273_v37 = vmul.f32 %v1266_v21, %v1259_v35  ;;  %v1274_v38 = vmul.f32 %v1270_v22, %v1260_v36  ;;  %1637 = vmatprep.subr.bf16.mxu0 %v1636_v32  ;;  %v1162_v19 = vcombine.low %v1141_v17, %v1143_v18  ;;  %v1676_v23 = vcombine.low %v1143_v18, %v1143_v18 }
 0x388   : > { %1639 = vmatpush1.bf16.msra.mxu0 %v1638_v33  ;;  %v1349_v50 = vld [vmem:[#allocation2 + $0x28] sm:$0xff]  ;;  %v1348_v53 = vld [vmem:[#allocation2 + $0x20] sm:$0xff] }
 0x389   : > { %1275 = vst [vmem:[#allocation2 + $0x50] sm:$0xf] %v1273_v37  ;;  %1276 = vst [vmem:[#allocation2 + $0x58] sm:$0xf] %v1274_v38  ;;  %v1280_v42 = vpop.permute.xlu1 %1279  ;;  %v1322_v4 = vpop.permute.xlu0 %1321 }
 0x38a   : > { %v1281_v43 = vsel %vm777_vm14, %v1278_v30, %v1280_v42  ;;  %v1282_v45 = vsel %vm777_vm14, %v1280_v42, %v1278_v30 }
 0x38b   : > { %v1295_v47 = vmul.f32 %v1288_v39, %v1281_v43  ;;  %v1296_v48 = vmul.f32 %v1292_v40, %v1282_v45 }
 0x38c   : > { %v1351_v52 = vld [vmem:[#allocation2 + $0x38] sm:$0xff]  ;;  %v1350_v54 = vld [vmem:[#allocation2 + $0x30] sm:$0xff] }
 0x38d   : > { %1297 = vst [vmem:[#allocation2 + $0x60] sm:$0xf] %v1295_v47  ;;  %1298 = vst [vmem:[#allocation2 + $0x68] sm:$0xf] %v1296_v48  ;;  %v1302_v55 = vpop.permute.xlu1 %1301  ;;  %v1640_v56 = vpack.c.bf16 %v1351_v52, %v1349_v50  ;;  %v1642_v57 = vpack.c.bf16 %v1350_v54, %v1348_v53 }
 0x38e   : > { %v1303_v58 = vsel %vm801_vm15, %v1300_v46, %v1302_v55  ;;  %v1304_v59 = vsel %vm801_vm15, %v1302_v55, %v1300_v46 }
 0x38f   : > { %v1317_v60 = vmul.f32 %v1310_v49, %v1303_v58  ;;  %v1318_v61 = vmul.f32 %v1314_v44, %v1304_v59  ;;  %1641 = vmatprep.subr.bf16.mxu0 %v1640_v56 }
 0x390   : > { %1643 = vmatpush1.bf16.msra.mxu0 %v1642_v57  ;;  %v1355_v1 = vld [vmem:[#allocation2 + $0x58] sm:$0xff]  ;;  %v1354_v3 = vld [vmem:[#allocation2 + $0x50] sm:$0xff] }
 0x391   : > { %1319 = vst [vmem:[#allocation2 + $0x70] sm:$0xf] %v1317_v60  ;;  %1320 = vst [vmem:[#allocation2 + $0x78] sm:$0xf] %v1318_v61  ;;  %v1324_v5 = vpop.permute.xlu1 %1323  ;;  %v1644_v6 = vpack.c.bf16 %v1355_v1, %v1353_v0  ;;  %v1646_v7 = vpack.c.bf16 %v1354_v3, %v1352_v63 }
 0x392   : > { %v1325_v8 = vsel %vm825_vm0, %v1322_v4, %v1324_v5  ;;  %v1326_v9 = vsel %vm825_vm0, %v1324_v5, %v1322_v4 }
 0x393   : > { %v1339_v26 = vmul.f32 %v1332_v62, %v1325_v8  ;;  %v1340_v10 = vmul.f32 %v1336_v34, %v1326_v9  ;;  %1645 = vmatprep.subr.bf16.mxu0 %v1644_v6 }
 0x394   : > { %1647 = vmatpush1.bf16.msra.mxu0 %v1646_v7  ;;  %v1357_v27 = vld [vmem:[#allocation2 + $0x68] sm:$0xff]  ;;  %v1356_v12 = vld [vmem:[#allocation2 + $0x60] sm:$0xff] }
 0x395   : > { %1341 = vst [vmem:[#allocation2 + $0x80] sm:$0xf] %v1339_v26  ;;  %1342 = vst [vmem:[#allocation2 + $0x88] sm:$0xf] %v1340_v10 }
 0x398   : > { %v1359_v11 = vld [vmem:[#allocation2 + $0x78] sm:$0xff]  ;;  %v1358_v13 = vld [vmem:[#allocation2 + $0x70] sm:$0xff] }
 0x399   : > { %v1648_v14 = vpack.c.bf16 %v1359_v11, %v1357_v27  ;;  %v1650_v15 = vpack.c.bf16 %v1358_v13, %v1356_v12 }
 0x39a   : > { %v1441_v21 = vpop.permute.xlu0 %1440 }
 0x39b   : > { %1649 = vmatprep.subr.bf16.mxu0 %v1648_v14 }
 0x39c   : > { %1651 = vmatpush1.bf16.msra.mxu0 %v1650_v15  ;;  %v1361_v16 = vld [vmem:[#allocation2 + $0x88] sm:$0xff]  ;;  %v1360_v2 = vld [vmem:[#allocation2 + $0x80] sm:$0xff] }
 0x39d   : > { %1382 = vmatprep.subr.mxu0 %v1361_v16 }
 0x3a0   : > { %1383 = vmatpush1.msra.mxu0 %v1360_v2 }
 0x3a1   : > { %1571 = vmatmul.mubr.msk.f32.vlgmr.msra.gmra.mrb[8].mxu0 %vm1362_vm1, %v1343_v25 }
 0x474   : > { %v1432_v22 = vpop.f32.mrb[8].mxu0 }
 0x475   : > { %v1443_v24 = vadd.f32 %v1441_v21, %v1432_v22  ;;  %v1434_v28 = vpop.f32.mrb[9].mxu0 }
 0x476   : > { %v1444_v29 = vadd.f32 %v1441_v21, %v1434_v28 }
 0x477   : > { %v1449_v20 = vadd.f32 %v1443_v24, %v1162_v19 }
 0x478   : > { %v1450_v30 = vadd.f32 %v1676_v23, %v1444_v29 }
 0x479   : > { %vm1451_vm4 = vcmp.ge.f32.partialorder %v1449_v20, 0.0  ;;  %v1453_v31 = vmul.f32 0.2, %v1449_v20 }
 0x47a   : > { %vm1452_vm5 = vcmp.ge.f32.partialorder %v1450_v30, 0.0  ;;  %v1454_v32 = vmul.f32 0.2, %v1450_v30 }
 0x47b   : > { %v1455_v33 = vsel %vm1451_vm4, %v1449_v20, %v1453_v31 }
 0x47c   : > { %v1456_v35 = vsel %vm1452_vm5, %v1450_v30, %v1454_v32 }
 0x47d   : > { %v1459_v36 = vcombine.low %v1455_v33, %v1456_v35 }
 0x47f   : > { %1461 = vst [vmem:[%s325_s29] sm:$0xff] %v1459_v36 }
 0x480 PF: > { %s18_s27 = sadd.s32 1, %s1683_s27  }
 0x481   : > { %p15_p4 = scmp.ge.s32.totalorder %s18_s27, 4  }
 0x483   :  { %17 = sbr.rel (!%p15_p4) target bundleno = 1 (0x1), region = 92 }

</bundles_post_ra>
